<compile_context>
chip_gen: v5e
topology: v5e:2x2
jax: 0.10.0
libtpu: 0.0.40
codegen_flags: <defaults>
</compile_context>

<pallas_src>
import math

import jax
import jax.numpy as jnp
from jax.experimental import pallas as pl
from jax.experimental.pallas import tpu as pltpu

# ---------------- model config (small, consistent with the module) -----------
B = 2          # batch
S = 8          # sequence length
H = 32         # hid_dim
N_HEADS = 4
HEAD_DIM = H // N_HEADS
PF = 64        # pf_dim
EPS = 1e-5     # nn.LayerNorm default eps


def _layer_norm_ref(x, gamma, beta):
    mu = jnp.mean(x, axis=-1, keepdims=True)
    var = jnp.mean((x - mu) ** 2, axis=-1, keepdims=True)
    return (x - mu) * jax.lax.rsqrt(var + EPS) * gamma + beta


def _layer_norm_onepass(x, gamma, beta):
    # single-pass E[x^2] - E[x]^2: one cross-lane reduction pass instead of two
    mu = jnp.mean(x, axis=-1, keepdims=True)
    ms = jnp.mean(x * x, axis=-1, keepdims=True)
    var = ms - mu * mu
    return (x - mu) * jax.lax.rsqrt(var + EPS) * gamma + beta


def encoder_layer_kernel(
    x_ref,        # [B*S, H]   flattened activations
    maskb_ref,    # [B, 1, S]  additive mask bias (0.0 attend / -1e10 masked)
    wqkvo_ref,    # [H, 4H]    (Wq | Wk | Wv | Wo), each stored [in, out]
    bqkvo_ref,    # [1, 4H]
    w1_ref,       # [H, PF]
    b1_ref,       # [1, PF]
    w2_ref,       # [PF, H]
    misc_ref,     # [5, H]     rows: ln1_g, ln1_b, ln2_g, ln2_b, fc2_bias
    out_ref,      # [B*S, H]
    ctx_ref,      # VMEM scratch [B*S, H] — per-head context accumulator
):
    x = x_ref[...]                                    # [BS, H]
    w_qkvo = wqkvo_ref[...]                           # [H, 4H]
    b_qkvo = bqkvo_ref[...]                           # [1, 4H]

    # ---- fused Q/K/V projection: one MXU push of N = 3H ---------------------
    qkv = jnp.dot(x, w_qkvo[:, :3 * H],
                  preferred_element_type=jnp.float32) + b_qkvo[:, :3 * H]
    q = qkv[:, 0:H]
    k = qkv[:, H:2 * H]
    v = qkv[:, 2 * H:3 * H]
    kT = k.T                                          # single transpose, [H, BS]

    inv_scale = jnp.float32(1.0 / math.sqrt(HEAD_DIM))

    # ---- attention: static loops (mask is batch-dependent) ------------------
    for b in range(B):
        r0, r1 = b * S, (b + 1) * S
        bias = maskb_ref[b]                           # [1, S], broadcasts over queries
        for h in range(N_HEADS):
            lo, hi = h * HEAD_DIM, (h + 1) * HEAD_DIM
            energy = (jnp.dot(q[r0:r1, lo:hi], kT[lo:hi, r0:r1],
                              preferred_element_type=jnp.float32) * inv_scale
                      + bias)                         # [S, S]
            m = jnp.max(energy, axis=-1, keepdims=True)
            p = jnp.exp(energy - m)
            denom = jnp.sum(p, axis=-1, keepdims=True)
            attn = p * pl.reciprocal(denom, approx=False)   # softmax
            # TODO(synk): attention dropout is identity in eval mode (no RNG).
            # write head output straight into its lane slice (no concatenate)
            ctx_ref[r0:r1, lo:hi] = jnp.dot(attn, v[r0:r1, lo:hi],
                                            preferred_element_type=jnp.float32)

    attn_out = (jnp.dot(ctx_ref[...], w_qkvo[:, 3 * H:4 * H],
                        preferred_element_type=jnp.float32)
                + b_qkvo[:, 3 * H:4 * H])

    # ---- residual + self_attn_layer_norm ------------------------------------
    x1 = _layer_norm_onepass(x + attn_out, misc_ref[0:1, :], misc_ref[1:2, :])

    # ---- PositionwiseFeedforwardLayer ----------------------------------------
    ff = jnp.dot(x1, w1_ref[...], preferred_element_type=jnp.float32) + b1_ref[...]
    ff = jnp.maximum(ff, 0.0)                                         # ReLU
    ff = jnp.dot(ff, w2_ref[...], preferred_element_type=jnp.float32) + misc_ref[4:5, :]

    # ---- residual + ff_layer_norm --------------------------------------------
    x2 = _layer_norm_onepass(x1 + ff, misc_ref[2:3, :], misc_ref[3:4, :])
    out_ref[...] = x2.astype(out_ref.dtype)
    # TODO(synk): bf16 MXU operands (v6e/v7x) and a lane-dense [B, S*H] output
    # layout (v5e) are further wins but need a looser tolerance / in-kernel
    # relayout at this tiny size, so they are left out here.


def transformer_encoder_layer(src, src_mask, params):
    """src: [B, S, H] f32, src_mask: [B, 1, S] f32 (1.0 = attend, 0.0 = masked)."""
    (wq, bq, wk, bk, wv, bv, wo, bo,
     ln1_g, ln1_b, w1, b1, w2, b2, ln2_g, ln2_b) = params

    # wrapper-side packing: fewer, larger DMA blobs; additive mask precomputed
    x_flat = src.reshape(B * S, H)
    mask_bias = jnp.where(src_mask == 0.0, jnp.float32(-1e10), jnp.float32(0.0))
    w_qkvo = jnp.concatenate([wq, wk, wv, wo], axis=1)                # [H, 4H]
    b_qkvo = jnp.concatenate([bq, bk, bv, bo], axis=1)                # [1, 4H]
    misc = jnp.concatenate([ln1_g, ln1_b, ln2_g, ln2_b, b2], axis=0)  # [5, H]

    vmem = lambda: pl.BlockSpec(memory_space=pltpu.MemorySpace.VMEM)
    out = pl.pallas_call(
        encoder_layer_kernel,
        out_shape=jax.ShapeDtypeStruct((B * S, H), jnp.float32),
        in_specs=[vmem() for _ in range(8)],
        out_specs=vmem(),
        scratch_shapes=[pltpu.VMEM((B * S, H), jnp.float32)],
    )(x_flat, mask_bias, w_qkvo, b_qkvo, w1, b1, w2, misc)
    return out.reshape(B, S, H)


# ---------------- pure-JAX reference (for correctness check) -----------------
def reference(src, src_mask, params):
    (wq, bq, wk, bk, wv, bv, wo, bo,
     g1, be1, w1, b1, w2, b2, g2, be2) = params
    q = src @ wq + bq
    k = src @ wk + bk
    v = src @ wv + bv

    def split(t):  # [B,S,H] -> [B,nh,S,hd]
        return t.reshape(B, S, N_HEADS, HEAD_DIM).transpose(0, 2, 1, 3)

    qh, kh, vh = split(q), split(k), split(v)
    energy = jnp.einsum("bhqd,bhkd->bhqk", qh, kh) / math.sqrt(HEAD_DIM)
    m = src_mask[:, None, :, :]  # [B,1,1,S]
    energy = jnp.where(m == 0.0, -1e10, energy)
    attn = jax.nn.softmax(energy, axis=-1)
    ctx = jnp.einsum("bhqk,bhkd->bhqd", attn, vh)
    ctx = ctx.transpose(0, 2, 1, 3).reshape(B, S, H)
    attn_out = ctx @ wo + bo

    x1 = _layer_norm_ref(src + attn_out, g1, be1)
    ff = jnp.maximum(x1 @ w1 + b1, 0.0) @ w2 + b2
    return _layer_norm_ref(x1 + ff, g2, be2)


if __name__ == "__main__":
    key = jax.random.PRNGKey(0)
    keys = jax.random.split(key, 16)

    def lin(kw, fan_in, fan_out):
        # deterministic small init; stored as [in, out] (i.e. W^T of nn.Linear)
        return jax.random.normal(kw, (fan_in, fan_out), jnp.float32) * (1.0 / math.sqrt(fan_in))

    wq, wk, wv, wo = (lin(keys[i], H, H) for i in range(4))
    bq = jax.random.normal(keys[4], (1, H), jnp.float32) * 0.02
    bk = jax.random.normal(keys[5], (1, H), jnp.float32) * 0.02
    bv = jax.random.normal(keys[6], (1, H), jnp.float32) * 0.02
    bo = jax.random.normal(keys[7], (1, H), jnp.float32) * 0.02
    w1 = lin(keys[8], H, PF)
    b1 = jax.random.normal(keys[9], (1, PF), jnp.float32) * 0.02
    w2 = lin(keys[10], PF, H)
    b2 = jax.random.normal(keys[11], (1, H), jnp.float32) * 0.02
    ln1_g = jnp.ones((1, H), jnp.float32)
    ln1_b = jnp.zeros((1, H), jnp.float32)
    ln2_g = jnp.ones((1, H), jnp.float32)
    ln2_b = jnp.zeros((1, H), jnp.float32)

    params = (wq, bq, wk, bk, wv, bv, wo, bo,
              ln1_g, ln1_b, w1, b1, w2, b2, ln2_g, ln2_b)

    src = jax.random.normal(keys[12], (B, S, H), jnp.float32)
    # mask: second batch element masks out the last two key positions
    src_mask = jnp.ones((B, 1, S), jnp.float32)
    src_mask = src_mask.at[1, 0, S - 2:].set(0.0)

    out = transformer_encoder_layer(src, src_mask, params)
    out = jax.block_until_ready(out)

    ref = reference(src, src_mask, params)
    assert out.shape == (B, S, H)
    assert jnp.allclose(out, ref, atol=1e-4, rtol=1e-4), (
        f"max abs err = {jnp.max(jnp.abs(out - ref))}")

    print("KERNEL_OK")
</pallas_src>

<mosaic_0001>
module attributes {stable_mosaic.version = 11 : i64} {
  func.func @encoder_layer_kernel(%arg0: memref<16x32xf32, #tpu.memory_space<vmem>>, %arg1: memref<2x1x8xf32, #tpu.memory_space<vmem>>, %arg2: memref<32x128xf32, #tpu.memory_space<vmem>>, %arg3: memref<1x128xf32, #tpu.memory_space<vmem>>, %arg4: memref<32x64xf32, #tpu.memory_space<vmem>>, %arg5: memref<1x64xf32, #tpu.memory_space<vmem>>, %arg6: memref<64x32xf32, #tpu.memory_space<vmem>>, %arg7: memref<5x32xf32, #tpu.memory_space<vmem>>, %arg8: memref<16x32xf32, #tpu.memory_space<vmem>>, %arg9: memref<16x32xf32, #tpu.memory_space<vmem>>) attributes {dimension_semantics = [], scalar_prefetch = 0 : i64, scratch_operands = 1 : i64, tpu.core_type = #tpu.core_type<tc>} {
    %c0 = arith.constant 0 : index
    %c0_0 = arith.constant 0 : index
    %0 = vector.load %arg0[%c0, %c0_0] : memref<16x32xf32, #tpu.memory_space<vmem>>, vector<16x32xf32>
    %c0_1 = arith.constant 0 : index
    %c0_2 = arith.constant 0 : index
    %1 = vector.load %arg2[%c0_1, %c0_2] : memref<32x128xf32, #tpu.memory_space<vmem>>, vector<32x128xf32>
    %c0_3 = arith.constant 0 : index
    %c0_4 = arith.constant 0 : index
    %2 = vector.load %arg3[%c0_3, %c0_4] : memref<1x128xf32, #tpu.memory_space<vmem>>, vector<1x128xf32>
    %3 = vector.extract_strided_slice %1 {offsets = [0, 0], sizes = [32, 96], strides = [1, 1]} : vector<32x128xf32> to vector<32x96xf32>
    %cst = arith.constant dense<0.000000e+00> : vector<16x96xf32>
    %4 = tpu.matmul %0, %3, %cst {dimension_numbers = #tpu.dot_dimension_numbers<[1], [0], [0], [1], [0, 0, 1, 1], [], []>} : vector<16x32xf32>, vector<32x96xf32>, vector<16x96xf32> -> vector<16x96xf32>
    %5 = vector.extract_strided_slice %2 {offsets = [0, 0], sizes = [1, 96], strides = [1, 1]} : vector<1x128xf32> to vector<1x96xf32>
    %6 = vector.broadcast %5 : vector<1x96xf32> to vector<16x96xf32>
    %7 = arith.addf %4, %6 : vector<16x96xf32>
    %8 = vector.extract_strided_slice %7 {offsets = [0, 0], sizes = [16, 32], strides = [1, 1]} : vector<16x96xf32> to vector<16x32xf32>
    %9 = vector.extract_strided_slice %7 {offsets = [0, 32], sizes = [16, 32], strides = [1, 1]} : vector<16x96xf32> to vector<16x32xf32>
    %10 = vector.extract_strided_slice %7 {offsets = [0, 64], sizes = [16, 32], strides = [1, 1]} : vector<16x96xf32> to vector<16x32xf32>
    %11 = tpu.transpose %9, [1, 0] : vector<16x32xf32> -> vector<32x16xf32>
    %c0_5 = arith.constant 0 : index
    %c0_6 = arith.constant 0 : index
    %c0_7 = arith.constant 0 : index
    %12 = vector.load %arg1[%c0_5, %c0_6, %c0_7] : memref<2x1x8xf32, #tpu.memory_space<vmem>>, vector<1x1x8xf32>
    %13 = vector.shape_cast %12 : vector<1x1x8xf32> to vector<1x8xf32>
    %14 = vector.extract_strided_slice %8 {offsets = [0, 0], sizes = [8, 8], strides = [1, 1]} : vector<16x32xf32> to vector<8x8xf32>
    %15 = vector.extract_strided_slice %11 {offsets = [0, 0], sizes = [8, 8], strides = [1, 1]} : vector<32x16xf32> to vector<8x8xf32>
    %cst_8 = arith.constant dense<0.000000e+00> : vector<8x8xf32>
    %16 = tpu.matmul %14, %15, %cst_8 {dimension_numbers = #tpu.dot_dimension_numbers<[1], [0], [0], [1], [0, 0, 1, 1], [], []>} : vector<8x8xf32>, vector<8x8xf32>, vector<8x8xf32> -> vector<8x8xf32>
    %cst_9 = arith.constant 0.353553385 : f32
    %17 = vector.broadcast %cst_9 : f32 to vector<8x8xf32>
    %18 = arith.mulf %16, %17 : vector<8x8xf32>
    %19 = vector.broadcast %13 : vector<1x8xf32> to vector<8x8xf32>
    %20 = arith.addf %18, %19 : vector<8x8xf32>
    %cst_10 = arith.constant dense<0xFF800000> : vector<8xf32>
    %21 = vector.multi_reduction <maximumf>, %20, %cst_10 [1] : vector<8x8xf32> to vector<8xf32>
    %22 = vector.shape_cast %21 : vector<8xf32> to vector<8x1xf32>
    %23 = vector.broadcast %22 : vector<8x1xf32> to vector<8x8xf32>
    %24 = arith.subf %20, %23 : vector<8x8xf32>
    %25 = math.exp %24 : vector<8x8xf32>
    %cst_11 = arith.constant dense<0.000000e+00> : vector<8xf32>
    %26 = vector.multi_reduction <add>, %25, %cst_11 [1] : vector<8x8xf32> to vector<8xf32>
    %27 = vector.shape_cast %26 : vector<8xf32> to vector<8x1xf32>
    %28 = tpu.reciprocal %27 : vector<8x1xf32> -> vector<8x1xf32>
    %29 = vector.broadcast %28 : vector<8x1xf32> to vector<8x8xf32>
    %30 = arith.mulf %25, %29 : vector<8x8xf32>
    %31 = vector.extract_strided_slice %10 {offsets = [0, 0], sizes = [8, 8], strides = [1, 1]} : vector<16x32xf32> to vector<8x8xf32>
    %cst_12 = arith.constant dense<0.000000e+00> : vector<8x8xf32>
    %32 = tpu.matmul %30, %31, %cst_12 {dimension_numbers = #tpu.dot_dimension_numbers<[1], [0], [0], [1], [0, 0, 1, 1], [], []>} : vector<8x8xf32>, vector<8x8xf32>, vector<8x8xf32> -> vector<8x8xf32>
    %c0_13 = arith.constant 0 : index
    %c0_14 = arith.constant 0 : index
    %33 = vector.load %arg9[%c0_13, %c0_14] : memref<16x32xf32, #tpu.memory_space<vmem>>, vector<8x8xf32>
    tpu.vector_store %arg9[%c0_13, %c0_14], %32 {strides = array<i32>} : memref<16x32xf32, #tpu.memory_space<vmem>>, vector<8x8xf32>,
    %34 = vector.extract_strided_slice %8 {offsets = [0, 8], sizes = [8, 8], strides = [1, 1]} : vector<16x32xf32> to vector<8x8xf32>
    %35 = vector.extract_strided_slice %11 {offsets = [8, 0], sizes = [8, 8], strides = [1, 1]} : vector<32x16xf32> to vector<8x8xf32>
    %cst_15 = arith.constant dense<0.000000e+00> : vector<8x8xf32>
    %36 = tpu.matmul %34, %35, %cst_15 {dimension_numbers = #tpu.dot_dimension_numbers<[1], [0], [0], [1], [0, 0, 1, 1], [], []>} : vector<8x8xf32>, vector<8x8xf32>, vector<8x8xf32> -> vector<8x8xf32>
    %cst_16 = arith.constant 0.353553385 : f32
    %37 = vector.broadcast %cst_16 : f32 to vector<8x8xf32>
    %38 = arith.mulf %36, %37 : vector<8x8xf32>
    %39 = vector.broadcast %13 : vector<1x8xf32> to vector<8x8xf32>
    %40 = arith.addf %38, %39 : vector<8x8xf32>
    %cst_17 = arith.constant dense<0xFF800000> : vector<8xf32>
    %41 = vector.multi_reduction <maximumf>, %40, %cst_17 [1] : vector<8x8xf32> to vector<8xf32>
    %42 = vector.shape_cast %41 : vector<8xf32> to vector<8x1xf32>
    %43 = vector.broadcast %42 : vector<8x1xf32> to vector<8x8xf32>
    %44 = arith.subf %40, %43 : vector<8x8xf32>
    %45 = math.exp %44 : vector<8x8xf32>
    %cst_18 = arith.constant dense<0.000000e+00> : vector<8xf32>
    %46 = vector.multi_reduction <add>, %45, %cst_18 [1] : vector<8x8xf32> to vector<8xf32>
    %47 = vector.shape_cast %46 : vector<8xf32> to vector<8x1xf32>
    %48 = tpu.reciprocal %47 : vector<8x1xf32> -> vector<8x1xf32>
    %49 = vector.broadcast %48 : vector<8x1xf32> to vector<8x8xf32>
    %50 = arith.mulf %45, %49 : vector<8x8xf32>
    %51 = vector.extract_strided_slice %10 {offsets = [0, 8], sizes = [8, 8], strides = [1, 1]} : vector<16x32xf32> to vector<8x8xf32>
    %cst_19 = arith.constant dense<0.000000e+00> : vector<8x8xf32>
    %52 = tpu.matmul %50, %51, %cst_19 {dimension_numbers = #tpu.dot_dimension_numbers<[1], [0], [0], [1], [0, 0, 1, 1], [], []>} : vector<8x8xf32>, vector<8x8xf32>, vector<8x8xf32> -> vector<8x8xf32>
    %c0_20 = arith.constant 0 : index
    %c8 = arith.constant 8 : index
    %53 = vector.load %arg9[%c0_20, %c8] : memref<16x32xf32, #tpu.memory_space<vmem>>, vector<8x8xf32>
    tpu.vector_store %arg9[%c0_20, %c8], %52 {strides = array<i32>} : memref<16x32xf32, #tpu.memory_space<vmem>>, vector<8x8xf32>,
    %54 = vector.extract_strided_slice %8 {offsets = [0, 16], sizes = [8, 8], strides = [1, 1]} : vector<16x32xf32> to vector<8x8xf32>
    %55 = vector.extract_strided_slice %11 {offsets = [16, 0], sizes = [8, 8], strides = [1, 1]} : vector<32x16xf32> to vector<8x8xf32>
    %cst_21 = arith.constant dense<0.000000e+00> : vector<8x8xf32>
    %56 = tpu.matmul %54, %55, %cst_21 {dimension_numbers = #tpu.dot_dimension_numbers<[1], [0], [0], [1], [0, 0, 1, 1], [], []>} : vector<8x8xf32>, vector<8x8xf32>, vector<8x8xf32> -> vector<8x8xf32>
    %cst_22 = arith.constant 0.353553385 : f32
    %57 = vector.broadcast %cst_22 : f32 to vector<8x8xf32>
    %58 = arith.mulf %56, %57 : vector<8x8xf32>
    %59 = vector.broadcast %13 : vector<1x8xf32> to vector<8x8xf32>
    %60 = arith.addf %58, %59 : vector<8x8xf32>
    %cst_23 = arith.constant dense<0xFF800000> : vector<8xf32>
    %61 = vector.multi_reduction <maximumf>, %60, %cst_23 [1] : vector<8x8xf32> to vector<8xf32>
    %62 = vector.shape_cast %61 : vector<8xf32> to vector<8x1xf32>
    %63 = vector.broadcast %62 : vector<8x1xf32> to vector<8x8xf32>
    %64 = arith.subf %60, %63 : vector<8x8xf32>
    %65 = math.exp %64 : vector<8x8xf32>
    %cst_24 = arith.constant dense<0.000000e+00> : vector<8xf32>
    %66 = vector.multi_reduction <add>, %65, %cst_24 [1] : vector<8x8xf32> to vector<8xf32>
    %67 = vector.shape_cast %66 : vector<8xf32> to vector<8x1xf32>
    %68 = tpu.reciprocal %67 : vector<8x1xf32> -> vector<8x1xf32>
    %69 = vector.broadcast %68 : vector<8x1xf32> to vector<8x8xf32>
    %70 = arith.mulf %65, %69 : vector<8x8xf32>
    %71 = vector.extract_strided_slice %10 {offsets = [0, 16], sizes = [8, 8], strides = [1, 1]} : vector<16x32xf32> to vector<8x8xf32>
    %cst_25 = arith.constant dense<0.000000e+00> : vector<8x8xf32>
    %72 = tpu.matmul %70, %71, %cst_25 {dimension_numbers = #tpu.dot_dimension_numbers<[1], [0], [0], [1], [0, 0, 1, 1], [], []>} : vector<8x8xf32>, vector<8x8xf32>, vector<8x8xf32> -> vector<8x8xf32>
    %c0_26 = arith.constant 0 : index
    %c16 = arith.constant 16 : index
    %73 = vector.load %arg9[%c0_26, %c16] : memref<16x32xf32, #tpu.memory_space<vmem>>, vector<8x8xf32>
    tpu.vector_store %arg9[%c0_26, %c16], %72 {strides = array<i32>} : memref<16x32xf32, #tpu.memory_space<vmem>>, vector<8x8xf32>,
    %74 = vector.extract_strided_slice %8 {offsets = [0, 24], sizes = [8, 8], strides = [1, 1]} : vector<16x32xf32> to vector<8x8xf32>
    %75 = vector.extract_strided_slice %11 {offsets = [24, 0], sizes = [8, 8], strides = [1, 1]} : vector<32x16xf32> to vector<8x8xf32>
    %cst_27 = arith.constant dense<0.000000e+00> : vector<8x8xf32>
    %76 = tpu.matmul %74, %75, %cst_27 {dimension_numbers = #tpu.dot_dimension_numbers<[1], [0], [0], [1], [0, 0, 1, 1], [], []>} : vector<8x8xf32>, vector<8x8xf32>, vector<8x8xf32> -> vector<8x8xf32>
    %cst_28 = arith.constant 0.353553385 : f32
    %77 = vector.broadcast %cst_28 : f32 to vector<8x8xf32>
    %78 = arith.mulf %76, %77 : vector<8x8xf32>
    %79 = vector.broadcast %13 : vector<1x8xf32> to vector<8x8xf32>
    %80 = arith.addf %78, %79 : vector<8x8xf32>
    %cst_29 = arith.constant dense<0xFF800000> : vector<8xf32>
    %81 = vector.multi_reduction <maximumf>, %80, %cst_29 [1] : vector<8x8xf32> to vector<8xf32>
    %82 = vector.shape_cast %81 : vector<8xf32> to vector<8x1xf32>
    %83 = vector.broadcast %82 : vector<8x1xf32> to vector<8x8xf32>
    %84 = arith.subf %80, %83 : vector<8x8xf32>
    %85 = math.exp %84 : vector<8x8xf32>
    %cst_30 = arith.constant dense<0.000000e+00> : vector<8xf32>
    %86 = vector.multi_reduction <add>, %85, %cst_30 [1] : vector<8x8xf32> to vector<8xf32>
    %87 = vector.shape_cast %86 : vector<8xf32> to vector<8x1xf32>
    %88 = tpu.reciprocal %87 : vector<8x1xf32> -> vector<8x1xf32>
    %89 = vector.broadcast %88 : vector<8x1xf32> to vector<8x8xf32>
    %90 = arith.mulf %85, %89 : vector<8x8xf32>
    %91 = vector.extract_strided_slice %10 {offsets = [0, 24], sizes = [8, 8], strides = [1, 1]} : vector<16x32xf32> to vector<8x8xf32>
    %cst_31 = arith.constant dense<0.000000e+00> : vector<8x8xf32>
    %92 = tpu.matmul %90, %91, %cst_31 {dimension_numbers = #tpu.dot_dimension_numbers<[1], [0], [0], [1], [0, 0, 1, 1], [], []>} : vector<8x8xf32>, vector<8x8xf32>, vector<8x8xf32> -> vector<8x8xf32>
    %c0_32 = arith.constant 0 : index
    %c24 = arith.constant 24 : index
    %93 = vector.load %arg9[%c0_32, %c24] : memref<16x32xf32, #tpu.memory_space<vmem>>, vector<8x8xf32>
    tpu.vector_store %arg9[%c0_32, %c24], %92 {strides = array<i32>} : memref<16x32xf32, #tpu.memory_space<vmem>>, vector<8x8xf32>,
    %c1 = arith.constant 1 : index
    %c0_33 = arith.constant 0 : index
    %c0_34 = arith.constant 0 : index
    %94 = vector.load %arg1[%c1, %c0_33, %c0_34] : memref<2x1x8xf32, #tpu.memory_space<vmem>>, vector<1x1x8xf32>
    %95 = vector.shape_cast %94 : vector<1x1x8xf32> to vector<1x8xf32>
    %96 = vector.extract_strided_slice %8 {offsets = [8, 0], sizes = [8, 8], strides = [1, 1]} : vector<16x32xf32> to vector<8x8xf32>
    %97 = vector.extract_strided_slice %11 {offsets = [0, 8], sizes = [8, 8], strides = [1, 1]} : vector<32x16xf32> to vector<8x8xf32>
    %cst_35 = arith.constant dense<0.000000e+00> : vector<8x8xf32>
    %98 = tpu.matmul %96, %97, %cst_35 {dimension_numbers = #tpu.dot_dimension_numbers<[1], [0], [0], [1], [0, 0, 1, 1], [], []>} : vector<8x8xf32>, vector<8x8xf32>, vector<8x8xf32> -> vector<8x8xf32>
    %cst_36 = arith.constant 0.353553385 : f32
    %99 = vector.broadcast %cst_36 : f32 to vector<8x8xf32>
    %100 = arith.mulf %98, %99 : vector<8x8xf32>
    %101 = vector.broadcast %95 : vector<1x8xf32> to vector<8x8xf32>
    %102 = arith.addf %100, %101 : vector<8x8xf32>
    %cst_37 = arith.constant dense<0xFF800000> : vector<8xf32>
    %103 = vector.multi_reduction <maximumf>, %102, %cst_37 [1] : vector<8x8xf32> to vector<8xf32>
    %104 = vector.shape_cast %103 : vector<8xf32> to vector<8x1xf32>
    %105 = vector.broadcast %104 : vector<8x1xf32> to vector<8x8xf32>
    %106 = arith.subf %102, %105 : vector<8x8xf32>
    %107 = math.exp %106 : vector<8x8xf32>
    %cst_38 = arith.constant dense<0.000000e+00> : vector<8xf32>
    %108 = vector.multi_reduction <add>, %107, %cst_38 [1] : vector<8x8xf32> to vector<8xf32>
    %109 = vector.shape_cast %108 : vector<8xf32> to vector<8x1xf32>
    %110 = tpu.reciprocal %109 : vector<8x1xf32> -> vector<8x1xf32>
    %111 = vector.broadcast %110 : vector<8x1xf32> to vector<8x8xf32>
    %112 = arith.mulf %107, %111 : vector<8x8xf32>
    %113 = vector.extract_strided_slice %10 {offsets = [8, 0], sizes = [8, 8], strides = [1, 1]} : vector<16x32xf32> to vector<8x8xf32>
    %cst_39 = arith.constant dense<0.000000e+00> : vector<8x8xf32>
    %114 = tpu.matmul %112, %113, %cst_39 {dimension_numbers = #tpu.dot_dimension_numbers<[1], [0], [0], [1], [0, 0, 1, 1], [], []>} : vector<8x8xf32>, vector<8x8xf32>, vector<8x8xf32> -> vector<8x8xf32>
    %c8_40 = arith.constant 8 : index
    %c0_41 = arith.constant 0 : index
    %115 = vector.load %arg9[%c8_40, %c0_41] : memref<16x32xf32, #tpu.memory_space<vmem>>, vector<8x8xf32>
    tpu.vector_store %arg9[%c8_40, %c0_41], %114 {strides = array<i32>} : memref<16x32xf32, #tpu.memory_space<vmem>>, vector<8x8xf32>,
    %116 = vector.extract_strided_slice %8 {offsets = [8, 8], sizes = [8, 8], strides = [1, 1]} : vector<16x32xf32> to vector<8x8xf32>
    %117 = vector.extract_strided_slice %11 {offsets = [8, 8], sizes = [8, 8], strides = [1, 1]} : vector<32x16xf32> to vector<8x8xf32>
    %cst_42 = arith.constant dense<0.000000e+00> : vector<8x8xf32>
    %118 = tpu.matmul %116, %117, %cst_42 {dimension_numbers = #tpu.dot_dimension_numbers<[1], [0], [0], [1], [0, 0, 1, 1], [], []>} : vector<8x8xf32>, vector<8x8xf32>, vector<8x8xf32> -> vector<8x8xf32>
    %cst_43 = arith.constant 0.353553385 : f32
    %119 = vector.broadcast %cst_43 : f32 to vector<8x8xf32>
    %120 = arith.mulf %118, %119 : vector<8x8xf32>
    %121 = vector.broadcast %95 : vector<1x8xf32> to vector<8x8xf32>
    %122 = arith.addf %120, %121 : vector<8x8xf32>
    %cst_44 = arith.constant dense<0xFF800000> : vector<8xf32>
    %123 = vector.multi_reduction <maximumf>, %122, %cst_44 [1] : vector<8x8xf32> to vector<8xf32>
    %124 = vector.shape_cast %123 : vector<8xf32> to vector<8x1xf32>
    %125 = vector.broadcast %124 : vector<8x1xf32> to vector<8x8xf32>
    %126 = arith.subf %122, %125 : vector<8x8xf32>
    %127 = math.exp %126 : vector<8x8xf32>
    %cst_45 = arith.constant dense<0.000000e+00> : vector<8xf32>
    %128 = vector.multi_reduction <add>, %127, %cst_45 [1] : vector<8x8xf32> to vector<8xf32>
    %129 = vector.shape_cast %128 : vector<8xf32> to vector<8x1xf32>
    %130 = tpu.reciprocal %129 : vector<8x1xf32> -> vector<8x1xf32>
    %131 = vector.broadcast %130 : vector<8x1xf32> to vector<8x8xf32>
    %132 = arith.mulf %127, %131 : vector<8x8xf32>
    %133 = vector.extract_strided_slice %10 {offsets = [8, 8], sizes = [8, 8], strides = [1, 1]} : vector<16x32xf32> to vector<8x8xf32>
    %cst_46 = arith.constant dense<0.000000e+00> : vector<8x8xf32>
    %134 = tpu.matmul %132, %133, %cst_46 {dimension_numbers = #tpu.dot_dimension_numbers<[1], [0], [0], [1], [0, 0, 1, 1], [], []>} : vector<8x8xf32>, vector<8x8xf32>, vector<8x8xf32> -> vector<8x8xf32>
    %c8_47 = arith.constant 8 : index
    %c8_48 = arith.constant 8 : index
    %135 = vector.load %arg9[%c8_47, %c8_48] : memref<16x32xf32, #tpu.memory_space<vmem>>, vector<8x8xf32>
    tpu.vector_store %arg9[%c8_47, %c8_48], %134 {strides = array<i32>} : memref<16x32xf32, #tpu.memory_space<vmem>>, vector<8x8xf32>,
    %136 = vector.extract_strided_slice %8 {offsets = [8, 16], sizes = [8, 8], strides = [1, 1]} : vector<16x32xf32> to vector<8x8xf32>
    %137 = vector.extract_strided_slice %11 {offsets = [16, 8], sizes = [8, 8], strides = [1, 1]} : vector<32x16xf32> to vector<8x8xf32>
    %cst_49 = arith.constant dense<0.000000e+00> : vector<8x8xf32>
    %138 = tpu.matmul %136, %137, %cst_49 {dimension_numbers = #tpu.dot_dimension_numbers<[1], [0], [0], [1], [0, 0, 1, 1], [], []>} : vector<8x8xf32>, vector<8x8xf32>, vector<8x8xf32> -> vector<8x8xf32>
    %cst_50 = arith.constant 0.353553385 : f32
    %139 = vector.broadcast %cst_50 : f32 to vector<8x8xf32>
    %140 = arith.mulf %138, %139 : vector<8x8xf32>
    %141 = vector.broadcast %95 : vector<1x8xf32> to vector<8x8xf32>
    %142 = arith.addf %140, %141 : vector<8x8xf32>
    %cst_51 = arith.constant dense<0xFF800000> : vector<8xf32>
    %143 = vector.multi_reduction <maximumf>, %142, %cst_51 [1] : vector<8x8xf32> to vector<8xf32>
    %144 = vector.shape_cast %143 : vector<8xf32> to vector<8x1xf32>
    %145 = vector.broadcast %144 : vector<8x1xf32> to vector<8x8xf32>
    %146 = arith.subf %142, %145 : vector<8x8xf32>
    %147 = math.exp %146 : vector<8x8xf32>
    %cst_52 = arith.constant dense<0.000000e+00> : vector<8xf32>
    %148 = vector.multi_reduction <add>, %147, %cst_52 [1] : vector<8x8xf32> to vector<8xf32>
    %149 = vector.shape_cast %148 : vector<8xf32> to vector<8x1xf32>
    %150 = tpu.reciprocal %149 : vector<8x1xf32> -> vector<8x1xf32>
    %151 = vector.broadcast %150 : vector<8x1xf32> to vector<8x8xf32>
    %152 = arith.mulf %147, %151 : vector<8x8xf32>
    %153 = vector.extract_strided_slice %10 {offsets = [8, 16], sizes = [8, 8], strides = [1, 1]} : vector<16x32xf32> to vector<8x8xf32>
    %cst_53 = arith.constant dense<0.000000e+00> : vector<8x8xf32>
    %154 = tpu.matmul %152, %153, %cst_53 {dimension_numbers = #tpu.dot_dimension_numbers<[1], [0], [0], [1], [0, 0, 1, 1], [], []>} : vector<8x8xf32>, vector<8x8xf32>, vector<8x8xf32> -> vector<8x8xf32>
    %c8_54 = arith.constant 8 : index
    %c16_55 = arith.constant 16 : index
    %155 = vector.load %arg9[%c8_54, %c16_55] : memref<16x32xf32, #tpu.memory_space<vmem>>, vector<8x8xf32>
    tpu.vector_store %arg9[%c8_54, %c16_55], %154 {strides = array<i32>} : memref<16x32xf32, #tpu.memory_space<vmem>>, vector<8x8xf32>,
    %156 = vector.extract_strided_slice %8 {offsets = [8, 24], sizes = [8, 8], strides = [1, 1]} : vector<16x32xf32> to vector<8x8xf32>
    %157 = vector.extract_strided_slice %11 {offsets = [24, 8], sizes = [8, 8], strides = [1, 1]} : vector<32x16xf32> to vector<8x8xf32>
    %cst_56 = arith.constant dense<0.000000e+00> : vector<8x8xf32>
    %158 = tpu.matmul %156, %157, %cst_56 {dimension_numbers = #tpu.dot_dimension_numbers<[1], [0], [0], [1], [0, 0, 1, 1], [], []>} : vector<8x8xf32>, vector<8x8xf32>, vector<8x8xf32> -> vector<8x8xf32>
    %cst_57 = arith.constant 0.353553385 : f32
    %159 = vector.broadcast %cst_57 : f32 to vector<8x8xf32>
    %160 = arith.mulf %158, %159 : vector<8x8xf32>
    %161 = vector.broadcast %95 : vector<1x8xf32> to vector<8x8xf32>
    %162 = arith.addf %160, %161 : vector<8x8xf32>
    %cst_58 = arith.constant dense<0xFF800000> : vector<8xf32>
    %163 = vector.multi_reduction <maximumf>, %162, %cst_58 [1] : vector<8x8xf32> to vector<8xf32>
    %164 = vector.shape_cast %163 : vector<8xf32> to vector<8x1xf32>
    %165 = vector.broadcast %164 : vector<8x1xf32> to vector<8x8xf32>
    %166 = arith.subf %162, %165 : vector<8x8xf32>
    %167 = math.exp %166 : vector<8x8xf32>
    %cst_59 = arith.constant dense<0.000000e+00> : vector<8xf32>
    %168 = vector.multi_reduction <add>, %167, %cst_59 [1] : vector<8x8xf32> to vector<8xf32>
    %169 = vector.shape_cast %168 : vector<8xf32> to vector<8x1xf32>
    %170 = tpu.reciprocal %169 : vector<8x1xf32> -> vector<8x1xf32>
    %171 = vector.broadcast %170 : vector<8x1xf32> to vector<8x8xf32>
    %172 = arith.mulf %167, %171 : vector<8x8xf32>
    %173 = vector.extract_strided_slice %10 {offsets = [8, 24], sizes = [8, 8], strides = [1, 1]} : vector<16x32xf32> to vector<8x8xf32>
    %cst_60 = arith.constant dense<0.000000e+00> : vector<8x8xf32>
    %174 = tpu.matmul %172, %173, %cst_60 {dimension_numbers = #tpu.dot_dimension_numbers<[1], [0], [0], [1], [0, 0, 1, 1], [], []>} : vector<8x8xf32>, vector<8x8xf32>, vector<8x8xf32> -> vector<8x8xf32>
    %c8_61 = arith.constant 8 : index
    %c24_62 = arith.constant 24 : index
    %175 = vector.load %arg9[%c8_61, %c24_62] : memref<16x32xf32, #tpu.memory_space<vmem>>, vector<8x8xf32>
    tpu.vector_store %arg9[%c8_61, %c24_62], %174 {strides = array<i32>} : memref<16x32xf32, #tpu.memory_space<vmem>>, vector<8x8xf32>,
    %c0_63 = arith.constant 0 : index
    %c0_64 = arith.constant 0 : index
    %176 = vector.load %arg9[%c0_63, %c0_64] : memref<16x32xf32, #tpu.memory_space<vmem>>, vector<16x32xf32>
    %177 = vector.extract_strided_slice %1 {offsets = [0, 96], sizes = [32, 32], strides = [1, 1]} : vector<32x128xf32> to vector<32x32xf32>
    %cst_65 = arith.constant dense<0.000000e+00> : vector<16x32xf32>
    %178 = tpu.matmul %176, %177, %cst_65 {dimension_numbers = #tpu.dot_dimension_numbers<[1], [0], [0], [1], [0, 0, 1, 1], [], []>} : vector<16x32xf32>, vector<32x32xf32>, vector<16x32xf32> -> vector<16x32xf32>
    %179 = vector.extract_strided_slice %2 {offsets = [0, 96], sizes = [1, 32], strides = [1, 1]} : vector<1x128xf32> to vector<1x32xf32>
    %180 = vector.broadcast %179 : vector<1x32xf32> to vector<16x32xf32>
    %181 = arith.addf %178, %180 : vector<16x32xf32>
    %182 = arith.addf %0, %181 : vector<16x32xf32>
    %c0_66 = arith.constant 0 : index
    %c0_67 = arith.constant 0 : index
    %183 = vector.load %arg7[%c0_66, %c0_67] : memref<5x32xf32, #tpu.memory_space<vmem>>, vector<1x32xf32>
    %c1_68 = arith.constant 1 : index
    %c0_69 = arith.constant 0 : index
    %184 = vector.load %arg7[%c1_68, %c0_69] : memref<5x32xf32, #tpu.memory_space<vmem>>, vector<1x32xf32>
    %cst_70 = arith.constant dense<0.000000e+00> : vector<16xf32>
    %185 = vector.multi_reduction <add>, %182, %cst_70 [1] : vector<16x32xf32> to vector<16xf32>
    %186 = vector.shape_cast %185 : vector<16xf32> to vector<16x1xf32>
    %cst_71 = arith.constant 3.200000e+01 : f32
    %187 = vector.broadcast %cst_71 : f32 to vector<16x1xf32>
    %188 = arith.divf %186, %187 : vector<16x1xf32>
    %189 = arith.mulf %182, %182 : vector<16x32xf32>
    %cst_72 = arith.constant dense<0.000000e+00> : vector<16xf32>
    %190 = vector.multi_reduction <add>, %189, %cst_72 [1] : vector<16x32xf32> to vector<16xf32>
    %191 = vector.shape_cast %190 : vector<16xf32> to vector<16x1xf32>
    %cst_73 = arith.constant 3.200000e+01 : f32
    %192 = vector.broadcast %cst_73 : f32 to vector<16x1xf32>
    %193 = arith.divf %191, %192 : vector<16x1xf32>
    %194 = arith.mulf %188, %188 : vector<16x1xf32>
    %195 = arith.subf %193, %194 : vector<16x1xf32>
    %196 = vector.broadcast %188 : vector<16x1xf32> to vector<16x32xf32>
    %197 = arith.subf %182, %196 : vector<16x32xf32>
    %cst_74 = arith.constant 9.99999974E-6 : f32
    %198 = vector.broadcast %cst_74 : f32 to vector<16x1xf32>
    %199 = arith.addf %195, %198 : vector<16x1xf32>
    %200 = math.rsqrt %199 : vector<16x1xf32>
    %201 = vector.broadcast %200 : vector<16x1xf32> to vector<16x32xf32>
    %202 = arith.mulf %197, %201 : vector<16x32xf32>
    %203 = vector.broadcast %183 : vector<1x32xf32> to vector<16x32xf32>
    %204 = arith.mulf %202, %203 : vector<16x32xf32>
    %205 = vector.broadcast %184 : vector<1x32xf32> to vector<16x32xf32>
    %206 = arith.addf %204, %205 : vector<16x32xf32>
    %c0_75 = arith.constant 0 : index
    %c0_76 = arith.constant 0 : index
    %207 = vector.load %arg4[%c0_75, %c0_76] : memref<32x64xf32, #tpu.memory_space<vmem>>, vector<32x64xf32>
    %cst_77 = arith.constant dense<0.000000e+00> : vector<16x64xf32>
    %208 = tpu.matmul %206, %207, %cst_77 {dimension_numbers = #tpu.dot_dimension_numbers<[1], [0], [0], [1], [0, 0, 1, 1], [], []>} : vector<16x32xf32>, vector<32x64xf32>, vector<16x64xf32> -> vector<16x64xf32>
    %c0_78 = arith.constant 0 : index
    %c0_79 = arith.constant 0 : index
    %209 = vector.load %arg5[%c0_78, %c0_79] : memref<1x64xf32, #tpu.memory_space<vmem>>, vector<1x64xf32>
    %210 = vector.broadcast %209 : vector<1x64xf32> to vector<16x64xf32>
    %211 = arith.addf %208, %210 : vector<16x64xf32>
    %cst_80 = arith.constant 0.000000e+00 : f32
    %212 = vector.broadcast %cst_80 : f32 to vector<16x64xf32>
    %213 = arith.maximumf %211, %212 : vector<16x64xf32>
    %c0_81 = arith.constant 0 : index
    %c0_82 = arith.constant 0 : index
    %214 = vector.load %arg6[%c0_81, %c0_82] : memref<64x32xf32, #tpu.memory_space<vmem>>, vector<64x32xf32>
    %cst_83 = arith.constant dense<0.000000e+00> : vector<16x32xf32>
    %215 = tpu.matmul %213, %214, %cst_83 {dimension_numbers = #tpu.dot_dimension_numbers<[1], [0], [0], [1], [0, 0, 1, 1], [], []>} : vector<16x64xf32>, vector<64x32xf32>, vector<16x32xf32> -> vector<16x32xf32>
    %c4 = arith.constant 4 : index
    %c0_84 = arith.constant 0 : index
    %216 = vector.load %arg7[%c4, %c0_84] : memref<5x32xf32, #tpu.memory_space<vmem>>, vector<1x32xf32>
    %217 = vector.broadcast %216 : vector<1x32xf32> to vector<16x32xf32>
    %218 = arith.addf %215, %217 : vector<16x32xf32>
    %219 = arith.addf %206, %218 : vector<16x32xf32>
    %c2 = arith.constant 2 : index
    %c0_85 = arith.constant 0 : index
    %220 = vector.load %arg7[%c2, %c0_85] : memref<5x32xf32, #tpu.memory_space<vmem>>, vector<1x32xf32>
    %c3 = arith.constant 3 : index
    %c0_86 = arith.constant 0 : index
    %221 = vector.load %arg7[%c3, %c0_86] : memref<5x32xf32, #tpu.memory_space<vmem>>, vector<1x32xf32>
    %cst_87 = arith.constant dense<0.000000e+00> : vector<16xf32>
    %222 = vector.multi_reduction <add>, %219, %cst_87 [1] : vector<16x32xf32> to vector<16xf32>
    %223 = vector.shape_cast %222 : vector<16xf32> to vector<16x1xf32>
    %cst_88 = arith.constant 3.200000e+01 : f32
    %224 = vector.broadcast %cst_88 : f32 to vector<16x1xf32>
    %225 = arith.divf %223, %224 : vector<16x1xf32>
    %226 = arith.mulf %219, %219 : vector<16x32xf32>
    %cst_89 = arith.constant dense<0.000000e+00> : vector<16xf32>
    %227 = vector.multi_reduction <add>, %226, %cst_89 [1] : vector<16x32xf32> to vector<16xf32>
    %228 = vector.shape_cast %227 : vector<16xf32> to vector<16x1xf32>
    %cst_90 = arith.constant 3.200000e+01 : f32
    %229 = vector.broadcast %cst_90 : f32 to vector<16x1xf32>
    %230 = arith.divf %228, %229 : vector<16x1xf32>
    %231 = arith.mulf %225, %225 : vector<16x1xf32>
    %232 = arith.subf %230, %231 : vector<16x1xf32>
    %233 = vector.broadcast %225 : vector<16x1xf32> to vector<16x32xf32>
    %234 = arith.subf %219, %233 : vector<16x32xf32>
    %cst_91 = arith.constant 9.99999974E-6 : f32
    %235 = vector.broadcast %cst_91 : f32 to vector<16x1xf32>
    %236 = arith.addf %232, %235 : vector<16x1xf32>
    %237 = math.rsqrt %236 : vector<16x1xf32>
    %238 = vector.broadcast %237 : vector<16x1xf32> to vector<16x32xf32>
    %239 = arith.mulf %234, %238 : vector<16x32xf32>
    %240 = vector.broadcast %220 : vector<1x32xf32> to vector<16x32xf32>
    %241 = arith.mulf %239, %240 : vector<16x32xf32>
    %242 = vector.broadcast %221 : vector<1x32xf32> to vector<16x32xf32>
    %243 = arith.addf %241, %242 : vector<16x32xf32>
    %c0_92 = arith.constant 0 : index
    %c0_93 = arith.constant 0 : index
    %244 = vector.load %arg8[%c0_92, %c0_93] : memref<16x32xf32, #tpu.memory_space<vmem>>, vector<16x32xf32>
    tpu.vector_store %arg8[%c0_92, %c0_93], %243 {strides = array<i32>} : memref<16x32xf32, #tpu.memory_space<vmem>>, vector<16x32xf32>,
    return
  }
}

</mosaic_0001>

<bundles_post_ra>
// kernel: tpu_custom_call.1
= control target key start
LH: loop header
LB: loop body
LE: loop exit
PB: predicated region body
PF: predicated region fallthrough
CT: control target
= control target key end

     0   :  { %s1522_s0 = inlined_call_operand.vmem [shape: f32[16,32], index: 0, kind: input, shape index: {}]   ;;  %s1523_s1 = inlined_call_operand.vmem [shape: f32[2,1,8], index: 1, kind: input, shape index: {}]   ;;  %s1524_s2 = inlined_call_operand.vmem [shape: f32[32,128], index: 2, kind: input, shape index: {}]   ;;  %s1525_s3 = inlined_call_operand.vmem [shape: f32[1,128], index: 3, kind: input, shape index: {}]   ;;  %s1526_s4 = inlined_call_operand.vmem [shape: f32[32,64], index: 4, kind: input, shape index: {}]   ;;  %s1527_s5 = inlined_call_operand.vmem [shape: f32[1,64], index: 5, kind: input, shape index: {}]   ;;  %s1528_s6 = inlined_call_operand.vmem [shape: f32[64,32], index: 6, kind: input, shape index: {}]   ;;  %s1529_s7 = inlined_call_operand.vmem [shape: f32[5,32], index: 7, kind: input, shape index: {}]   ;;  %s1530_s8 = inlined_call_operand.hbm [shape: f32[16,32], index: 8, kind: output, shape index: {}]  }
   0x1   :  { %v1229_v0 = vld [vmem:[%s1524_s2 + $0x18] sm:$0xff]  ;;  %v1234_v1 = vld [vmem:[%s1524_s2 + $0x10] sm:$0xff]  ;;  %v1242_v3 = vld [vmem:[%s1524_s2 + $0x8] sm:$0xff] }
   0x2   :  { %59 = vmatpush.msra.mxu0 %v1229_v0  ;;  %v1076_v2 = vpack.i.bf16 %v1234_v1, %v1229_v0  ;;  %v1247_v4 = vld [vmem:[%s1524_s2] sm:$0xff] }
   0x3   :  { %v1081_v5 = vpack.i.bf16 %v1247_v4, %v1242_v3 }
   0x4   :  { %60 = vmatpush.msra.mxu0 %v1234_v1 }
   0x5   :  { %13 = vsyncpa [#allocation4], 0  ;;  %v1256_v6 = vld [vmem:[%s1522_s0] sm:$0xff]  ;;  %vm40_vm0 = vcmask 261120   ;;  %s1163_s16 = smov 120   ;;  %s1164_s17 = smov 96  }
   0x6   :  { %61 = vmatpush.msra.mxu0 %v1242_v3  ;;  %v1264_v7 = vld [vmem:[%s1525_s3] ss:$0 sm:$0xff]  ;;  %s1165_s18 = smov 64   ;;  %s1166_s19 = smov 80   ;;  %vm74_vm1 = vcmask 64512   ;;  %v1302_v42 = vld [vmem:[%s1522_s0 + $0x8] sm:$0xff] }
   0x7   :  { %s1167_s3 = smov 112   ;;  %v1286_v14 = vld [vmem:[%s1523_s1] ss:$0 sm:$0xff]  ;;  %s1168_s22 = smov 88  }
   0x8   :  { %62 = vmatpush.msra.mxu0 %v1247_v4  ;;  %s1169_s25 = smov 48   ;;  %s1170_s26 = smov 72  }
   0x9   :  { %1025 = vmatmul.msk.f32.vlgmr.msra.gmra.mxu0 %vm40_vm0, %v1256_v6  ;;  %s1171_s0 = smov 56   ;;  %s1172_s27 = smov 104  }
   0xa   :  { %s1174_s30 = smov 16   ;;  %s1175_s9 = smov 8  }
   0xb   :  { %s1176_s10 = smov 32   ;;  %s1177_s11 = smov 24  }
   0xc   :  { %s1013_s20 = sshll.u32 %s1530_s8, 4  ;;  %s1180_s21 = smov 128   ;;  %s1014_s20 = int_to_ptr.hbm [resolvable:$true] %s1013_s20 }
  0x11   :  { %1026 = vmatmul.msk.f32.gmra.mxu0 %vm40_vm0, %v1302_v42 }
  0x86   :  { %v64_v8 = vpop.f32.mrf.mxu0 }
  0x87   :  { %v1267_v9 = vadd.f32 %v1264_v7, %v64_v8 }
  0x89   :  { %155 = vrot.lane.b32.xlu2 %v1267_v9, %s1163_s16  ;;  %72 = vrot.lane.b32.xlu0 %v1267_v9, %s1164_s17 }
  0x8e   :  { %v67_v51 = vpop.f32.mrf.mxu0 }
  0x8f   :  { %v1313_v52 = vadd.f32 %v1264_v7, %v67_v51 }
  0x91   :  { %128 = vrot.lane.b32.xlu2 %v1267_v9, %s1165_s18 }
  0x99   :  { %243 = vrot.lane.b32.xlu2 %v1267_v9, %s1166_s19 }
  0xa1   :  { %241 = vrot.lane.b32.xlu2 %v1267_v9, %s1167_s3 }
  0xe3   :  { %v156_v10 = vpop.permute.xlu2 %155 }
  0xeb   :  { %v129_v11 = vpop.permute.xlu2 %128 }
  0xf3   :  { %v244_v13 = vpop.permute.xlu2 %243 }
  0xfb   :  { %v73_v12 = vpop.permute.xlu0 %72  ;;  %v242_v37 = vpop.permute.xlu2 %241 }
  0xfc   :  { %1027 = vmatpush.xpose.msk.msra.mxu1 %vm74_vm1, %v73_v12 }
  0xff   :  { %1028 = vmatmul.msk.f32.vlgmr.msra.gmra.mxu1 %vm74_vm1, %v1267_v9 }
 0x100   :  { %149 = vmatpush.msrb.mxu1 %v129_v11 }
 0x102   :  { %1033 = vmatpush.xpose.msk.msra.mxu1 %vm74_vm1, %v244_v13 }
 0x17c   :  { %v96_v15 = vpop.f32.mrf.mxu1 }
 0x17d   :  { %v99_v16 = vmul.f32 0.35355338, %v96_v15 }
 0x17f   :  { %v103_v17 = vadd.f32 %v1286_v14, %v99_v16 }
 0x181   :  { %v104_v18 = vsel %vm74_vm1, %v103_v17, -inf }
 0x182   :  { %105 = vmax.xlane.f32.xlu0 %v104_v18 }
 0x1f5   :  { %v106_v19 = vpop.xlane.xlu0 %105 }
 0x1f6   :  { %v107_v20 = vsub.f32 %v103_v17, %v106_v19 }
 0x1f8   :  { %v108_v21 = vmul.f32 1.442695, %v107_v20 }
 0x1fa   :  { %1095 = vpow2.f32 %v108_v21 }
 0x200   :  { %v1096_v22 = vpop.eup %1095 }
 0x201   :  { %v110_v23 = vsel %vm74_vm1, %v1096_v22, 0.0 }
 0x202   :  { %111 = vadd.xlane.f32.xlu1 %v110_v23 }
 0x21b   :  { %157 = vrot.lane.b32.xlu1 %v1267_v9, %s1168_s22 }
 0x275   :  { %v112_v24 = vpop.xlane.xlu1 %111 }
 0x276   :  { %1097 = vrcp.f32 %v112_v24  ;;  %v124_v28 = vand.u32 2147483648, %v112_v24  ;;  %v122_v30 = vand.u32 2147483647, %v112_v24  ;;  %vm118_vm3 = vweird.f32 %v112_v24 }
 0x278   :  { %v125_v32 = vor.u32 1.1754944e-38, %v124_v28  ;;  %vm123_vm5 = vcmp.eq.f32.partialorder %v122_v30, 8.507059e+37 }
 0x27c   :  { %v1098_v25 = vpop.eup %1097 }
 0x27d   :  { %v114_v26 = vmul.f32 %v1098_v25, %v112_v24  ;;  %vm119_vm2 = vweird.f32 %v1098_v25 }
 0x27e   :  { %vm120_vm4 = vmor %vm118_vm3, %vm119_vm2 }
 0x27f   :  { %v115_v27 = vsub.f32 1.0, %v114_v26 }
 0x281   :  { %v116_v29 = vmul.f32 %v1098_v25, %v115_v27 }
 0x283   :  { %v117_v31 = vadd.f32 %v1098_v25, %v116_v29 }
 0x285   :  { %v121_v33 = vsel %vm120_vm4, %v1098_v25, %v117_v31 }
 0x286   :  { %v126_v34 = vsel %vm123_vm5, %v125_v32, %v121_v33 }
 0x287   :  { %v127_v35 = vmul.f32 %v1096_v22, %v126_v34 }
 0x289   :  { %1029 = vmatmul.msk.f32.vlgmr.msrb.gmra.mxu1 %vm74_vm1, %v127_v35 }
 0x28d   :  { %v158_v36 = vpop.permute.xlu1 %157 }
 0x28e   :  { %1030 = vmatpush.xpose.msk.msra.mxu3 %vm74_vm1, %v158_v36 }
 0x291   :  { %1031 = vmatmul.msk.f32.vlgmr.msra.gmra.mxu3 %vm74_vm1, %v156_v10  ;;  %1034 = vmatmul.msk.f32.vlgmr.msra.gmra.mxu1 %vm74_vm1, %v242_v37 }
 0x306   :  { %v151_v38 = vpop.f32.mrf.mxu1 }
 0x307   :  { %154 = vst.msk [vmem:[#allocation2] sm:$0xff] %vm74_vm1, %v151_v38 }
 0x30e   :  { %v266_v39 = vpop.f32.mrf.mxu1 }
 0x30f   :  { %v269_v40 = vmul.f32 0.35355338, %v266_v39 }
 0x311   :  { %v270_v41 = vadd.f32 %v1286_v14, %v269_v40 }
 0x313   :  { %v271_v43 = vsel %vm74_vm1, %v270_v41, -inf }
 0x314   :  { %272 = vmax.xlane.f32.xlu1 %v271_v43  ;;  %v180_v44 = vpop.f32.mrf.mxu3 }
 0x315   :  { %v183_v45 = vmul.f32 0.35355338, %v180_v44 }
 0x317   :  { %v184_v46 = vadd.f32 %v1286_v14, %v183_v45 }
 0x319   :  { %v185_v47 = vsel %vm74_vm1, %v184_v46, -inf }
 0x31a   :  { %186 = vmax.xlane.f32.xlu2 %v185_v47  ;;  %v1088_v47 = vld [vmem:[%s1523_s1 + $0x1] ss:$0 sm:$0xff]  ;;  %s1173_s1 = smov 40  }
 0x32d   :  { %295 = vrot.lane.b32.xlu1 %v1267_v9, %s1169_s25 }
 0x332   :  { %329 = vrot.lane.b32.xlu2 %v1267_v9, %s1170_s26 }
 0x335   :  { %498 = vrot.lane.b32.xlu1 %v1313_v52, %s1163_s16 }
 0x33a   :  { %500 = vrot.lane.b32.xlu2 %v1313_v52, %s1168_s22 }
 0x33d   :  { %583 = vrot.lane.b32.xlu1 %v1313_v52, %s1167_s3 }
 0x342   :  { %670 = vrot.lane.b32.xlu2 %v1313_v52, %s1170_s26 }
 0x387   :  { %v273_v53 = vpop.xlane.xlu1 %272 }
 0x388   :  { %v274_v57 = vsub.f32 %v270_v41, %v273_v53 }
 0x38a   :  { %v275_v58 = vmul.f32 1.442695, %v274_v57 }
 0x38d   :  { %v187_v48 = vpop.xlane.xlu2 %186 }
 0x38e   :  { %v188_v49 = vsub.f32 %v184_v46, %v187_v48 }
 0x390   :  { %v189_v50 = vmul.f32 1.442695, %v188_v49 }
 0x392   :  { %1099 = vpow2.f32 %v189_v50 }
 0x393   :  { %1101 = vpow2.f32 %v275_v58 }
 0x395   :  { %v330_v10 = vpop.permute.xlu2 %329 }
 0x398   :  { %v1100_v54 = vpop.eup %1099 }
 0x399   :  { %v191_v55 = vsel %vm74_vm1, %v1100_v54, 0.0  ;;  %v1102_v59 = vpop.eup %1101 }
 0x39a   :  { %192 = vadd.xlane.f32.xlu0 %v191_v55  ;;  %v277_v60 = vsel %vm74_vm1, %v1102_v59, 0.0 }
 0x39d   :  { %v501_v20 = vpop.permute.xlu2 %500 }
 0x39f   :  { %v296_v56 = vpop.permute.xlu1 %295 }
 0x3a0   :  { %316 = vmatpush.msrb.mxu3 %v296_v56 }
 0x3a5   :  { %v671_v23 = vpop.permute.xlu2 %670 }
 0x3a7   :  { %v499_v25 = vpop.permute.xlu1 %498 }
 0x3ae   :  { %209 = vrot.lane.b32.xlu0 %v1267_v9, %s1171_s0 }
 0x3af   :  { %v584_v40 = vpop.permute.xlu1 %583 }
 0x3b6   :  { %327 = vrot.lane.b32.xlu0 %v1267_v9, %s1172_s27 }
 0x3be   :  { %416 = vrot.lane.b32.xlu0 %v1313_v52, %s1164_s17 }
 0x3c6   :  { %585 = vrot.lane.b32.xlu0 %v1313_v52, %s1166_s19 }
 0x3f0   :  { %278 = vadd.xlane.f32.xlu0 %v277_v60 }
 0x404   :  { %668 = vrot.lane.b32.xlu0 %v1313_v52, %s1172_s27 }
 0x40d   :  { %v193_v61 = vpop.xlane.xlu0 %192 }
 0x40e   :  { %1103 = vrcp.f32 %v193_v61  ;;  %v205_v11 = vand.u32 2147483648, %v193_v61  ;;  %v203_v13 = vand.u32 2147483647, %v193_v61  ;;  %vm199_vm7 = vweird.f32 %v193_v61 }
 0x410   :  { %v206_v16 = vor.u32 1.1754944e-38, %v205_v11  ;;  %vm204_vm9 = vcmp.eq.f32.partialorder %v203_v13, 8.507059e+37 }
 0x414   :  { %v1104_v62 = vpop.eup %1103 }
 0x415   :  { %v195_v63 = vmul.f32 %v1104_v62, %v193_v61  ;;  %vm200_vm6 = vweird.f32 %v1104_v62 }
 0x416   :  { %vm201_vm8 = vmor %vm199_vm7, %vm200_vm6 }
 0x417   :  { %v196_v8 = vsub.f32 1.0, %v195_v63 }
 0x419   :  { %v197_v12 = vmul.f32 %v1104_v62, %v196_v8 }
 0x41b   :  { %v198_v15 = vadd.f32 %v1104_v62, %v197_v12 }
 0x41d   :  { %v202_v17 = vsel %vm201_vm8, %v1104_v62, %v198_v15 }
 0x41e   :  { %v207_v18 = vsel %vm204_vm9, %v206_v16, %v202_v17 }
 0x41f   :  { %v208_v19 = vmul.f32 %v1100_v54, %v207_v18 }
 0x420   :  { %v210_v21 = vpop.permute.xlu0 %209 }
 0x421   :  { %230 = vmatpush.msra.mxu2 %v210_v21 }
 0x422   :  { %1032 = vmatmul.msk.f32.vlgmr.msra.gmra.mxu2 %vm74_vm1, %v208_v19 }
 0x423   :  { %1036 = vmatpush.xpose.msk.msrb.mxu2 %vm74_vm1, %v330_v10 }
 0x427   :  { %1043 = vmatpush.xpose.msk.msra.mxu2 %vm74_vm1, %v501_v20 }
 0x428   :  { %v328_v22 = vpop.permute.xlu0 %327 }
 0x42a   :  { %1037 = vmatmul.msk.f32.vlgmr.msrb.gmra.mxu2 %vm74_vm1, %v328_v22 }
 0x42b   :  { %1049 = vmatpush.xpose.msk.msrb.mxu2 %vm74_vm1, %v671_v23 }
 0x430   :  { %v417_v24 = vpop.permute.xlu0 %416 }
 0x431   :  { %1040 = vmatpush.xpose.msk.msra.mxu3 %vm74_vm1, %v417_v24 }
 0x432   :  { %1044 = vmatmul.msk.f32.vlgmr.msra.gmra.mxu2 %vm74_vm1, %v499_v25 }
 0x438   :  { %v586_v26 = vpop.permute.xlu0 %585 }
 0x463   :  { %v279_v27 = vpop.xlane.xlu0 %278 }
 0x464   :  { %1105 = vrcp.f32 %v279_v27  ;;  %v291_v31 = vand.u32 2147483648, %v279_v27  ;;  %v289_v33 = vand.u32 2147483647, %v279_v27  ;;  %vm285_vm11 = vweird.f32 %v279_v27 }
 0x466   :  { %v292_v35 = vor.u32 1.1754944e-38, %v291_v31  ;;  %vm290_vm13 = vcmp.eq.f32.partialorder %v289_v33, 8.507059e+37 }
 0x46a   :  { %v1106_v28 = vpop.eup %1105 }
 0x46b   :  { %v281_v29 = vmul.f32 %v1106_v28, %v279_v27  ;;  %vm286_vm10 = vweird.f32 %v1106_v28 }
 0x46c   :  { %vm287_vm12 = vmor %vm285_vm11, %vm286_vm10 }
 0x46d   :  { %v282_v30 = vsub.f32 1.0, %v281_v29 }
 0x46f   :  { %v283_v32 = vmul.f32 %v1106_v28, %v282_v30 }
 0x471   :  { %v284_v34 = vadd.f32 %v1106_v28, %v283_v32 }
 0x473   :  { %v288_v36 = vsel %vm287_vm12, %v1106_v28, %v284_v34 }
 0x474   :  { %v293_v37 = vsel %vm290_vm13, %v292_v35, %v288_v36 }
 0x475   :  { %v294_v38 = vmul.f32 %v1102_v59, %v293_v37 }
 0x476   :  { %v669_v39 = vpop.permute.xlu0 %668 }
 0x477   :  { %1035 = vmatmul.msk.f32.vlgmr.msrb.gmra.mxu3 %vm74_vm1, %v294_v38  ;;  %1050 = vmatmul.msk.f32.vlgmr.msrb.gmra.mxu2 %vm74_vm1, %v669_v39 }
 0x478   :  { %1046 = vmatpush.xpose.msk.msrb.mxu3 %vm74_vm1, %v586_v26 }
 0x47f   :  { %1041 = vmatmul.msk.f32.vlgmr.msra.gmra.mxu3 %vm74_vm1, %v1313_v52 }
 0x487   :  { %1047 = vmatmul.msk.f32.vlgmr.msrb.gmra.mxu3 %vm74_vm1, %v584_v40 }
 0x4a5   :  { %v1345_v41 = vpop.f32.mrf.mxu2 }
 0x4ad   :  { %v352_v43 = vpop.f32.mrf.mxu2 }
 0x4ae   :  { %v355_v44 = vmul.f32 0.35355338, %v352_v43 }
 0x4b0   :  { %v356_v45 = vadd.f32 %v1286_v14, %v355_v44 }
 0x4b2   :  { %v357_v46 = vsel %vm74_vm1, %v356_v45, -inf }
 0x4b3   :  { %358 = vmax.xlane.f32.xlu2 %v357_v46 }
 0x4b5   :  { %v523_v48 = vpop.f32.mrf.mxu2 }
 0x4b6   :  { %v526_v49 = vmul.f32 0.35355338, %v523_v48 }
 0x4b8   :  { %v527_v50 = vadd.f32 %v1088_v47, %v526_v49 }
 0x4ba   :  { %v528_v51 = vsel %vm74_vm1, %v527_v50, -inf }
 0x4bb   :  { %529 = vmax.xlane.f32.xlu0 %v528_v51 }
 0x4fa   :  { %v318_v53 = vpop.f32.mrf.mxu3  ;;  %v693_v56 = vpop.f32.mrf.mxu2 }
 0x4fb   :  { %v696_v58 = vmul.f32 0.35355338, %v693_v56 }
 0x4fd   :  { %v697_v61 = vadd.f32 %v1088_v47, %v696_v58 }
 0x4ff   :  { %v698_v63 = vsel %vm74_vm1, %v697_v61, -inf }
 0x502   :  { %v439_v54 = vpop.f32.mrf.mxu3 }
 0x503   :  { %v442_v55 = vmul.f32 0.35355338, %v439_v54 }
 0x505   :  { %v446_v57 = vadd.f32 %v1088_v47, %v442_v55 }
 0x507   :  { %v447_v14 = vsel %vm74_vm1, %v446_v57, -inf }
 0x508   :  { %448 = vmax.xlane.f32.xlu1 %v447_v14 }
 0x50a   :  { %v608_v59 = vpop.f32.mrf.mxu3 }
 0x50b   :  { %v611_v60 = vmul.f32 0.35355338, %v608_v59 }
 0x50d   :  { %v612_v62 = vadd.f32 %v1088_v47, %v611_v60 }
 0x50f   :  { %v613_v8 = vsel %vm74_vm1, %v612_v62, -inf }
 0x510   :  { %699 = vmax.xlane.f32.xlu1 %v698_v63  ;;  %614 = vmax.xlane.f32.xlu2 %v613_v8 }
 0x526   :  { %v359_v10 = vpop.xlane.xlu2 %358 }
 0x527   :  { %v360_v11 = vsub.f32 %v356_v45, %v359_v10 }
 0x529   :  { %v361_v12 = vmul.f32 1.442695, %v360_v11 }
 0x52b   :  { %1107 = vpow2.f32 %v361_v12 }
 0x52e   :  { %v530_v13 = vpop.xlane.xlu0 %529 }
 0x52f   :  { %v531_v15 = vsub.f32 %v527_v50, %v530_v13 }
 0x531   :  { %v1108_v16 = vpop.eup %1107  ;;  %v532_v17 = vmul.f32 1.442695, %v531_v15 }
 0x532   :  { %v363_v18 = vsel %vm74_vm1, %v1108_v16, 0.0 }
 0x533   :  { %1109 = vpow2.f32 %v532_v17  ;;  %364 = vadd.xlane.f32.xlu0 %v363_v18  ;;  %v869_v17 = vld [vmem:[%s1526_s4 + $0x8] sm:$0xff] }
 0x539   :  { %v1357_v19 = vpop.eup %1109 }
 0x53a   :  { %v534_v20 = vsel %vm74_vm1, %v1357_v19, 0.0 }
 0x53b   :  { %535 = vadd.xlane.f32.xlu1 %v534_v20 }
 0x547   :  { %471 = vrot.lane.b32.xlu0 %v1313_v52, %s1165_s18 }
 0x554   :  { %381 = vrot.lane.b32.xlu1 %v1267_v9, %s1173_s1 }
 0x55c   :  { %722 = vrot.lane.b32.xlu1 %v1313_v52, %s1173_s1 }
 0x57b   :  { %v449_v21 = vpop.xlane.xlu1 %448 }
 0x57c   :  { %v450_v28 = vsub.f32 %v446_v57, %v449_v21 }
 0x57e   :  { %v451_v29 = vmul.f32 1.442695, %v450_v28 }
 0x583   :  { %v615_v22 = vpop.xlane.xlu2 %614  ;;  %v700_v23 = vpop.xlane.xlu1 %699 }
 0x584   :  { %v616_v24 = vsub.f32 %v612_v62, %v615_v22  ;;  %v701_v25 = vsub.f32 %v697_v61, %v700_v23 }
 0x586   :  { %v617_v26 = vmul.f32 1.442695, %v616_v24  ;;  %v702_v27 = vmul.f32 1.442695, %v701_v25 }
 0x588   :  { %1111 = vpow2.f32 %v617_v26 }
 0x589   :  { %1113 = vpow2.f32 %v702_v27 }
 0x58a   :  { %1115 = vpow2.f32 %v451_v29 }
 0x58e   :  { %v1365_v30 = vpop.eup %1111 }
 0x58f   :  { %v1367_v31 = vpop.eup %1113  ;;  %v619_v9 = vsel %vm74_vm1, %v1365_v30, 0.0 }
 0x590   :  { %620 = vadd.xlane.f32.xlu0 %v619_v9  ;;  %v704_v32 = vsel %vm74_vm1, %v1367_v31, 0.0  ;;  %v1373_v33 = vpop.eup %1115 }
 0x591   :  { %705 = vadd.xlane.f32.xlu2 %v704_v32  ;;  %v453_v34 = vsel %vm74_vm1, %v1373_v33, 0.0 }
 0x599   :  { %454 = vadd.xlane.f32.xlu2 %v453_v34 }
 0x5a4   :  { %637 = vrot.lane.b32.xlu0 %v1313_v52, %s1169_s25 }
 0x5a6   :  { %v365_v35 = vpop.xlane.xlu0 %364 }
 0x5a7   :  { %1117 = vrcp.f32 %v365_v35  ;;  %v377_v44 = vand.u32 2147483648, %v365_v35  ;;  %vm371_vm15 = vweird.f32 %v365_v35  ;;  %v375_v45 = vand.u32 2147483647, %v365_v35 }
 0x5a9   :  { %v378_v48 = vor.u32 1.1754944e-38, %v377_v44  ;;  %vm376_vm3 = vcmp.eq.f32.partialorder %v375_v45, 8.507059e+37 }
 0x5ac   :  { %322 = vrot.lane.b32.xlu0 %v318_v53, %s1174_s30 }
 0x5ad   :  { %v1118_v36 = vpop.eup %1117 }
 0x5ae   :  { %v367_v37 = vmul.f32 %v1118_v36, %v365_v35  ;;  %vm372_vm14 = vweird.f32 %v1118_v36  ;;  %v536_v46 = vpop.xlane.xlu1 %535 }
 0x5af   :  { %vm373_vm2 = vmor %vm371_vm15, %vm372_vm14  ;;  %1119 = vrcp.f32 %v536_v46  ;;  %vm542_vm5 = vweird.f32 %v536_v46  ;;  %v546_v57 = vand.u32 2147483647, %v536_v46  ;;  %vm239_vm14 = vcmask 130112  }
 0x5b0   :  { %v368_v38 = vsub.f32 1.0, %v367_v37 }
 0x5b1   :  { %552 = vrot.lane.b32.xlu2 %v1313_v52, %s1171_s0  ;;  %vm547_vm7 = vcmp.eq.f32.partialorder %v546_v57, 8.507059e+37 }
 0x5b2   :  { %v369_v39 = vmul.f32 %v1118_v36, %v368_v38 }
 0x5b4   :  { %v370_v43 = vadd.f32 %v1118_v36, %v369_v39  ;;  %1082 = vrot.lane.b32.xlu0 %v1081_v5, %s1176_s10  ;;  %v548_v5 = vand.u32 2147483648, %v536_v46 }
 0x5b6   :  { %v374_v47 = vsel %vm373_vm2, %v1118_v36, %v370_v43  ;;  %v549_v59 = vor.u32 1.1754944e-38, %v548_v5 }
 0x5b7   :  { %v379_v49 = vsel %vm376_vm3, %v378_v48, %v374_v47  ;;  %vm325_vm3 = vcmask 195712  }
 0x5b8   :  { %v380_v50 = vmul.f32 %v1108_v16, %v379_v49 }
 0x5b9   :  { %236 = vrot.lane.b32.xlu2 %v1345_v41, %s1175_s9  ;;  %v472_v40 = vpop.permute.xlu0 %471  ;;  %v1120_v41 = vpop.eup %1119 }
 0x5ba   :  { %492 = vmatpush.msrb.mxu0 %v472_v40  ;;  %v538_v51 = vmul.f32 %v1120_v41, %v536_v46  ;;  %vm543_vm4 = vweird.f32 %v1120_v41 }
 0x5bb   :  { %vm544_vm6 = vmor %vm542_vm5, %vm543_vm4 }
 0x5bc   :  { %v539_v53 = vsub.f32 1.0, %v538_v51 }
 0x5be   :  { %v540_v56 = vmul.f32 %v1120_v41, %v539_v53 }
 0x5c0   :  { %v541_v3 = vadd.f32 %v1120_v41, %v540_v56 }
 0x5c1   :  { %1077 = vrot.lane.b32.xlu2 %v1076_v2, %s1176_s10 }
 0x5c2   :  { %v545_v2 = vsel %vm544_vm6, %v1120_v41, %v541_v3 }
 0x5c3   :  { %v550_v62 = vsel %vm547_vm7, %v549_v59, %v545_v2 }
 0x5c4   :  { %v551_v16 = vmul.f32 %v1357_v19, %v550_v62 }
 0x5c6   :  { %v382_v52 = vpop.permute.xlu1 %381 }
 0x5c7   :  { %402 = vmatpush.msrb.mxu1 %v382_v52 }
 0x5c8   :  { %1038 = vmatmul.msk.f32.vlgmr.msrb.gmra.mxu1 %vm74_vm1, %v380_v50 }
 0x5ce   :  { %v723_v18 = vpop.permute.xlu1 %722 }
 0x603   :  { %v1393_v54 = vpop.xlane.xlu0 %620 }
 0x604   :  { %v706_v55 = vpop.xlane.xlu2 %705  ;;  %v633_v36 = vand.u32 2147483648, %v1393_v54  ;;  %vm627_vm5 = vweird.f32 %v1393_v54  ;;  %v631_v38 = vand.u32 2147483647, %v1393_v54 }
 0x605   :  { %1121 = vrcp.f32 %v706_v55  ;;  %v716_v10 = vand.u32 2147483647, %v706_v55  ;;  %v718_v11 = vand.u32 2147483648, %v706_v55  ;;  %vm712_vm9 = vweird.f32 %v706_v55 }
 0x606   :  { %1123 = vrcp.f32 %v1393_v54  ;;  %v634_v43 = vor.u32 1.1754944e-38, %v633_v36  ;;  %vm632_vm7 = vcmp.eq.f32.partialorder %v631_v38, 8.507059e+37  ;;  %v1089_v36 = vld [vmem:[%s1529_s7] ss:$0 sm:$0xff] }
 0x607   :  { %vm717_vm11 = vcmp.eq.f32.partialorder %v716_v10, 8.507059e+37  ;;  %v719_v23 = vor.u32 1.1754944e-38, %v718_v11 }
 0x60b   :  { %v1122_v4 = vpop.eup %1121 }
 0x60c   :  { %v708_v58 = vmul.f32 %v1122_v4, %v706_v55  ;;  %v455_v0 = vpop.xlane.xlu2 %454  ;;  %v1396_v1 = vpop.eup %1123  ;;  %vm713_vm8 = vweird.f32 %v1122_v4 }
 0x60d   :  { %1125 = vrcp.f32 %v455_v0  ;;  %v623_v60 = vmul.f32 %v1396_v1, %v1393_v54  ;;  %vm1401_vm10 = vmor %vm712_vm9, %vm713_vm8  ;;  %v467_v24 = vand.u32 2147483648, %v455_v0  ;;  %v465_v26 = vand.u32 2147483647, %v455_v0 }
 0x60e   :  { %v709_v14 = vsub.f32 1.0, %v708_v58  ;;  %vm461_vm13 = vweird.f32 %v455_v0  ;;  %vm628_vm15 = vweird.f32 %v1396_v1  ;;  %vm411_vm8 = vcmask 261312  }
 0x60f   :  { %v624_v12 = vsub.f32 1.0, %v623_v60  ;;  %v468_v29 = vor.u32 1.1754944e-38, %v467_v24  ;;  %vm466_vm4 = vcmp.eq.f32.partialorder %v465_v26, 8.507059e+37  ;;  %vm629_vm6 = vmor %vm627_vm5, %vm628_vm15  ;;  %vm917_vm15 = vcmask 523264  }
 0x610   :  { %v710_v61 = vmul.f32 %v1122_v4, %v709_v14 }
 0x611   :  { %v625_v19 = vmul.f32 %v1396_v1, %v624_v12 }
 0x612   :  { %v711_v63 = vadd.f32 %v1122_v4, %v710_v61 }
 0x613   :  { %v1126_v8 = vpop.eup %1125  ;;  %v626_v9 = vadd.f32 %v1396_v1, %v625_v19 }
 0x614   :  { %v457_v13 = vmul.f32 %v1126_v8, %v455_v0  ;;  %v553_v15 = vpop.permute.xlu2 %552  ;;  %v715_v20 = vsel %vm1401_vm10, %v1122_v4, %v711_v63  ;;  %vm462_vm12 = vweird.f32 %v1126_v8 }
 0x615   :  { %573 = vmatpush.msra.mxu1 %v553_v15  ;;  %v720_v27 = vsel %vm717_vm11, %v719_v23, %v715_v20  ;;  %vm463_vm2 = vmor %vm461_vm13, %vm462_vm12  ;;  %v868_v20 = vld [vmem:[%s1526_s4] sm:$0xff] }
 0x616   :  { %v458_v21 = vsub.f32 1.0, %v457_v13  ;;  %1045 = vmatmul.msk.f32.vlgmr.msra.gmra.mxu1 %vm74_vm1, %v551_v16  ;;  %v638_v22 = vpop.permute.xlu0 %637  ;;  %v721_v34 = vmul.f32 %v1367_v31, %v720_v27  ;;  %v630_v31 = vsel %vm629_vm6, %v1396_v1, %v626_v9  ;;  %v870_v16 = vld [vmem:[%s1526_s4 + $0x10] sm:$0xff] }
 0x617   :  { %743 = vmatpush.msrb.mxu1 %v723_v18  ;;  %658 = vmatpush.msra.mxu0 %v638_v22  ;;  %v635_v44 = vsel %vm632_vm7, %v634_v43, %v630_v31 }
 0x618   :  { %v459_v25 = vmul.f32 %v1126_v8, %v458_v21  ;;  %v636_v45 = vmul.f32 %v1365_v30, %v635_v44 }
 0x61a   :  { %v460_v28 = vadd.f32 %v1126_v8, %v459_v25 }
 0x61c   :  { %v237_v32 = vpop.permute.xlu2 %236  ;;  %v464_v35 = vsel %vm463_vm2, %v1126_v8, %v460_v28  ;;  %v1178_v8 = vmov 32.0  }
 0x61d   :  { %240 = vst.msk [vmem:[#allocation2] sm:$0xff] %vm239_vm14, %v237_v32  ;;  %v469_v37 = vsel %vm466_vm4, %v468_v29, %v464_v35  ;;  %1127 = vrcp.f32 %v1178_v8  ;;  %v1092_v8 = vld [vmem:[%s1529_s7 + $0x4] ss:$0 sm:$0xff] }
 0x61e   :  { %1051 = vmatmul.msk.f32.vlgmr.msrb.gmra.mxu1 %vm74_vm1, %v721_v34  ;;  %v323_v39 = vpop.permute.xlu0 %322  ;;  %v470_v40 = vmul.f32 %v1373_v33, %v469_v37 }
 0x61f   :  { %326 = vst.msk [vmem:[#allocation2] sm:$0xff] %vm325_vm3, %v323_v39  ;;  %v1090_v39 = vld [vmem:[%s1529_s7 + $0x1] ss:$0 sm:$0xff] }
 0x620   :  { %1042 = vmatmul.msk.f32.vlgmr.msrb.gmra.mxu0 %vm74_vm1, %v470_v40 }
 0x623   :  { %v1128_v10 = vpop.eup %1127 }
 0x624   :  { %v1078_v33 = vpop.permute.xlu2 %1077  ;;  %v814_v11 = vmul.f32 32.0, %v1128_v10 }
 0x625   :  { %v1080_v47 = vunpack.i.h.bf16 %v1078_v33  ;;  %v1079_v48 = vunpack.i.l.bf16 %v1078_v33 }
 0x626   :  { %v1083_v52 = vpop.permute.xlu0 %1082  ;;  %v815_v12 = vsub.f32 1.0, %v814_v11 }
 0x627   :  { %792 = vmatpush.msra.mxu3 %v1079_v48  ;;  %v1085_v50 = vunpack.i.h.bf16 %v1083_v52  ;;  %v1084_v41 = vunpack.i.l.bf16 %v1083_v52 }
 0x628   :  { %1048 = vmatmul.msk.f32.vlgmr.msra.gmra.mxu0 %vm74_vm1, %v636_v45  ;;  %v816_v13 = vmul.f32 %v1128_v10, %v815_v12  ;;  %v914_v45 = vld [vmem:[%s1528_s6 + $0x38] sm:$0xff] }
 0x629   :  { %793 = vmatpush.msra.mxu3 %v1080_v47  ;;  %932 = vmatpush.msra.mxu2 %v914_v45 }
 0x62a   :  { %v817_v15 = vadd.f32 %v1128_v10, %v816_v13 }
 0x62b   :  { %794 = vmatpush.msra.mxu3 %v1084_v41 }
 0x62d   :  { %795 = vmatpush.msra.mxu3 %v1085_v50  ;;  %v911_v50 = vld [vmem:[%s1528_s6 + $0x20] sm:$0xff] }
 0x645   :  { %v404_v46 = vpop.f32.mrf.mxu1 }
 0x646   :  { %408 = vrot.lane.b32.xlu1 %v404_v46, %s1177_s11  ;;  %v913_v46 = vld [vmem:[%s1528_s6 + $0x30] sm:$0xff] }
 0x647   :  { %933 = vmatpush.msra.mxu2 %v913_v46 }
 0x693   :  { %v575_v49 = vpop.f32.mrf.mxu1 }
 0x694   :  { %579 = vrot.lane.b32.xlu1 %v575_v49, %s1175_s9  ;;  %v912_v49 = vld [vmem:[%s1528_s6 + $0x28] sm:$0xff] }
 0x695   :  { %934 = vmatpush.msra.mxu2 %v912_v49 }
 0x697   :  { %935 = vmatpush.msra.mxu2 %v911_v50 }
 0x69b   :  { %v745_v51 = vpop.f32.mrf.mxu1 }
 0x69c   :  { %749 = vrot.lane.b32.xlu0 %v745_v51, %s1177_s11  ;;  %771 = vrot.lane.b32.xlu1 %v1264_v7, %s1176_s10  ;;  %v910_v51 = vld [vmem:[%s1528_s6 + $0x18] sm:$0xff] }
 0x69d   :  { %v494_v30 = vpop.f32.mrf.mxu0  ;;  %936 = vmatpush.msra.mxu2 %v910_v51 }
 0x69e   :  { %497 = vst.msk [vmem:[#allocation2 + $0x8] sm:$0xff] %vm74_vm1, %v494_v30  ;;  %vm818_vm1 = vweird.f32 %v1128_v10 }
 0x69f   :  { %v1454_v18 = vsel %vm818_vm1, %v1128_v10, %v817_v15 }
 0x6a5   :  { %v660_v53 = vpop.f32.mrf.mxu0 }
 0x6a6   :  { %664 = vrot.lane.b32.xlu2 %v660_v53, %s1174_s30 }
 0x6b8   :  { %v409_v54 = vpop.permute.xlu1 %408 }
 0x6b9   :  { %412 = vst.msk [vmem:[#allocation2] sm:$0xff] %vm411_vm8, %v409_v54 }
 0x6c0   :  { %v753_v55 = vld [vmem:[#allocation2] sm:$0xff] }
 0x6c1   :  { %1052 = vmatmul.msk.f32.vlgmr.msra.gmra.mxu3 %vm40_vm0, %v753_v55 }
 0x700   :  { %v665_v3 = vpop.permute.xlu2 %664 }
 0x706   :  { %v580_v56 = vpop.permute.xlu1 %579 }
 0x707   :  { %582 = vst.msk [vmem:[#allocation2 + $0x8] sm:$0xff] %vm239_vm14, %v580_v56 }
 0x708   :  { %667 = vst.msk [vmem:[#allocation2 + $0x8] sm:$0xff] %vm325_vm3, %v665_v3 }
 0x70e   :  { %v750_v4 = vpop.permute.xlu0 %749  ;;  %v772_v5 = vpop.permute.xlu1 %771 }
 0x70f   :  { %752 = vst.msk [vmem:[#allocation2 + $0x8] sm:$0xff] %vm411_vm8, %v750_v4 }
 0x716   :  { %v754_v7 = vld [vmem:[#allocation2 + $0x8] sm:$0xff] }
 0x717   :  { %1053 = vmatmul.msk.f32.gmra.mxu3 %vm40_vm0, %v754_v7 }
 0x744   :  { %v797_v57 = vpop.f32.mrf.mxu3 }
 0x745   :  { %v798_v58 = vadd.f32 %v797_v57, %v772_v5 }
 0x747   :  { %v803_v0 = vadd.f32 %v798_v58, %v1256_v6 }
 0x749   :  { %v807_v1 = vsel %vm40_vm0, %v803_v0, 0.0  ;;  %v822_v2 = vmul.f32 %v803_v0, %v803_v0 }
 0x74a   :  { %808 = vadd.xlane.f32.xlu2 %v807_v1  ;;  %v908_v1 = vld [vmem:[%s1528_s6 + $0x8] sm:$0xff] }
 0x74b   :  { %v824_v14 = vsel %vm40_vm0, %v822_v2, 0.0  ;;  %v907_v2 = vld [vmem:[%s1528_s6] sm:$0xff] }
 0x74c   :  { %825 = vadd.xlane.f32.xlu0 %v824_v14  ;;  %v1091_v14 = vld [vmem:[%s1527_s5] ss:$0 sm:$0xff] }
 0x79a   :  { %v800_v59 = vpop.f32.mrf.mxu3 }
 0x79b   :  { %v801_v60 = vadd.f32 %v800_v59, %v772_v5 }
 0x79d   :  { %v1438_v61 = vadd.f32 %v801_v60, %v1302_v42  ;;  %v871_v42 = vld [vmem:[%s1526_s4 + $0x18] sm:$0xff] }
 0x79e   :  { %894 = vmatpush.msrb.mxu0 %v871_v42 }
 0x79f   :  { %v810_v62 = vsel %vm40_vm0, %v1438_v61, 0.0  ;;  %v823_v63 = vmul.f32 %v1438_v61, %v1438_v61 }
 0x7a0   :  { %811 = vadd.xlane.f32.xlu1 %v810_v62  ;;  %895 = vmatpush.msrb.mxu0 %v870_v16 }
 0x7a1   :  { %v827_v6 = vsel %vm40_vm0, %v823_v63, 0.0 }
 0x7a2   :  { %828 = vadd.xlane.f32.xlu2 %v827_v6  ;;  %896 = vmatpush.msrb.mxu0 %v869_v17 }
 0x7a4   :  { %897 = vmatpush.msrb.mxu0 %v868_v20 }
 0x7bd   :  { %v809_v21 = vpop.xlane.xlu2 %808 }
 0x7be   :  { %v820_v22 = vmul.f32 %v1454_v18, %v809_v21 }
 0x7bf   :  { %v826_v23 = vpop.xlane.xlu0 %825 }
 0x7c0   :  { %v832_v24 = vmul.f32 %v820_v22, %v820_v22  ;;  %v830_v19 = vmul.f32 %v826_v23, %v1454_v18  ;;  %v836_v35 = vsub.f32 %v803_v0, %v820_v22  ;;  %v909_v0 = vld [vmem:[%s1528_s6 + $0x10] sm:$0xff] }
 0x7c1   :  { %937 = vmatpush.msra.mxu2 %v909_v0 }
 0x7c2   :  { %v834_v25 = vsub.f32 %v830_v19, %v832_v24 }
 0x7c3   :  { %938 = vmatpush.msra.mxu2 %v908_v1 }
 0x7c4   :  { %v838_v26 = vadd.f32 1e-05, %v834_v25 }
 0x7c5   :  { %939 = vmatpush.msra.mxu2 %v907_v2 }
 0x7c6   :  { %1129 = vrsqrt.f32 %v838_v26  ;;  %vm846_vm10 = vweird.f32 %v838_v26 }
 0x7cc   :  { %v1130_v27 = vpop.eup %1129 }
 0x7cd   :  { %v841_v28 = vmul.f32 %v1130_v27, %v838_v26  ;;  %vm847_vm9 = vweird.f32 %v1130_v27 }
 0x7ce   :  { %vm848_vm11 = vmor %vm846_vm10, %vm847_vm9 }
 0x7cf   :  { %v842_v29 = vmul.f32 %v1130_v27, %v841_v28 }
 0x7d1   :  { %v843_v9 = vmul.f32 0.5, %v842_v29 }
 0x7d3   :  { %v844_v32 = vsub.f32 1.5, %v843_v9 }
 0x7d5   :  { %v845_v34 = vmul.f32 %v1130_v27, %v844_v32 }
 0x7d7   :  { %v849_v37 = vsel %vm848_vm11, %v1130_v27, %v845_v34 }
 0x7d8   :  { %v860_v38 = vmul.f32 %v849_v37, %v836_v35 }
 0x7da   :  { %v863_v40 = vmul.f32 %v1089_v36, %v860_v38 }
 0x7dc   :  { %v866_v31 = vadd.f32 %v1090_v39, %v863_v40 }
 0x7de   :  { %1054 = vmatmul.msk.f32.vlgmr.msrb.gmra.mxu0 %vm40_vm0, %v866_v31 }
 0x813   :  { %v812_v43 = vpop.xlane.xlu1 %811 }
 0x814   :  { %v821_v44 = vmul.f32 %v1454_v18, %v812_v43  ;;  %v1094_v43 = vld [vmem:[%s1529_s7 + $0x3] ss:$0 sm:$0xff] }
 0x815   :  { %v829_v33 = vpop.xlane.xlu2 %828 }
 0x816   :  { %v833_v47 = vmul.f32 %v821_v44, %v821_v44  ;;  %v831_v48 = vmul.f32 %v829_v33, %v1454_v18  ;;  %v837_v4 = vsub.f32 %v1438_v61, %v821_v44 }
 0x818   :  { %v835_v52 = vsub.f32 %v831_v48, %v833_v47 }
 0x81a   :  { %v839_v41 = vadd.f32 1e-05, %v835_v52 }
 0x81c   :  { %1131 = vrsqrt.f32 %v839_v41  ;;  %vm856_vm13 = vweird.f32 %v839_v41 }
 0x822   :  { %v1132_v30 = vpop.eup %1131 }
 0x823   :  { %v851_v53 = vmul.f32 %v1132_v30, %v839_v41  ;;  %vm857_vm12 = vweird.f32 %v1132_v30 }
 0x824   :  { %vm858_vm14 = vmor %vm856_vm13, %vm857_vm12 }
 0x825   :  { %v852_v54 = vmul.f32 %v1132_v30, %v851_v53 }
 0x827   :  { %v853_v55 = vmul.f32 0.5, %v852_v54 }
 0x829   :  { %v854_v56 = vsub.f32 1.5, %v853_v55 }
 0x82b   :  { %v855_v3 = vmul.f32 %v1132_v30, %v854_v56 }
 0x82d   :  { %v859_v7 = vsel %vm858_vm14, %v1132_v30, %v855_v3 }
 0x82e   :  { %v861_v5 = vmul.f32 %v859_v7, %v837_v4 }
 0x830   :  { %v864_v57 = vmul.f32 %v1089_v36, %v861_v5 }
 0x832   :  { %v867_v58 = vadd.f32 %v1090_v39, %v864_v57  ;;  %v1093_v39 = vld [vmem:[%s1529_s7 + $0x2] ss:$0 sm:$0xff]  ;;  %s1179_s7 = smov [#allocation3]  }
 0x833   :  { %s1011_s4 = sshll.u32 %s1179_s7, 4  ;;  %s1012_s4 = int_to_ptr.vmem [resolvable:$true] %s1011_s4 }
 0x834   :  { %1055 = vmatmul.msk.f32.gmra.mxu0 %vm40_vm0, %v867_v58 }
 0x85b   :  { %v899_v59 = vpop.f32.mrf.mxu0 }
 0x85c   :  { %v900_v60 = vadd.f32 %v1091_v14, %v899_v59 }
 0x85e   :  { %v905_v61 = vmax.f32 %v900_v60, 0.0 }
 0x860   :  { %1056 = vmatmul.msk.f32.vlgmr.msra.gmra.mxu2 %vm917_vm15, %v905_v61 }
 0x8b1   :  { %v902_v62 = vpop.f32.mrf.mxu0 }
 0x8b2   :  { %v903_v63 = vadd.f32 %v1091_v14, %v902_v62 }
 0x8b4   :  { %v906_v6 = vmax.f32 %v903_v63, 0.0 }
 0x8b6   :  { %1057 = vmatmul.msk.f32.gmra.mxu2 %vm917_vm15, %v906_v6 }
 0x8e3   :  { %v941_v10 = vpop.f32.mrf.mxu2 }
 0x8e4   :  { %v942_v11 = vadd.f32 %v1092_v8, %v941_v10 }
 0x8e6   :  { %v947_v12 = vadd.f32 %v942_v11, %v866_v31 }
 0x8e8   :  { %v951_v13 = vsel %vm40_vm0, %v947_v12, 0.0  ;;  %v959_v15 = vmul.f32 %v947_v12, %v947_v12 }
 0x8e9   :  { %952 = vadd.xlane.f32.xlu0 %v951_v13 }
 0x8ea   :  { %v961_v42 = vsel %vm40_vm0, %v959_v15, 0.0 }
 0x8eb   :  { %962 = vadd.xlane.f32.xlu2 %v961_v42 }
 0x939   :  { %v944_v16 = vpop.f32.mrf.mxu2 }
 0x93a   :  { %v945_v17 = vadd.f32 %v1092_v8, %v944_v16 }
 0x93c   :  { %v948_v20 = vadd.f32 %v945_v17, %v867_v58 }
 0x93e   :  { %v954_v21 = vsel %vm40_vm0, %v948_v20, 0.0  ;;  %v960_v22 = vmul.f32 %v948_v20, %v948_v20 }
 0x93f   :  { %955 = vadd.xlane.f32.xlu1 %v954_v21 }
 0x940   :  { %v964_v23 = vsel %vm40_vm0, %v960_v22, 0.0 }
 0x941   :  { %965 = vadd.xlane.f32.xlu0 %v964_v23 }
 0x95c   :  { %v953_v24 = vpop.xlane.xlu0 %952 }
 0x95d   :  { %v957_v19 = vmul.f32 %v953_v24, %v1454_v18 }
 0x95e   :  { %v963_v25 = vpop.xlane.xlu2 %962 }
 0x95f   :  { %v969_v26 = vmul.f32 %v957_v19, %v957_v19  ;;  %v967_v27 = vmul.f32 %v963_v25, %v1454_v18  ;;  %v973_v38 = vsub.f32 %v947_v12, %v957_v19 }
 0x961   :  { %v971_v28 = vsub.f32 %v967_v27, %v969_v26 }
 0x963   :  { %v975_v29 = vadd.f32 1e-05, %v971_v28 }
 0x965   :  { %1133 = vrsqrt.f32 %v975_v29  ;;  %vm983_vm3 = vweird.f32 %v975_v29 }
 0x96b   :  { %v1134_v9 = vpop.eup %1133 }
 0x96c   :  { %v978_v32 = vmul.f32 %v1134_v9, %v975_v29  ;;  %vm984_vm2 = vweird.f32 %v1134_v9 }
 0x96d   :  { %vm985_vm4 = vmor %vm983_vm3, %vm984_vm2 }
 0x96e   :  { %v979_v34 = vmul.f32 %v1134_v9, %v978_v32 }
 0x970   :  { %v980_v35 = vmul.f32 0.5, %v979_v34 }
 0x972   :  { %v981_v36 = vsub.f32 1.5, %v980_v35 }
 0x974   :  { %v982_v37 = vmul.f32 %v1134_v9, %v981_v36 }
 0x976   :  { %v986_v40 = vsel %vm985_vm4, %v1134_v9, %v982_v37 }
 0x977   :  { %v997_v31 = vmul.f32 %v986_v40, %v973_v38 }
 0x979   :  { %v1000_v44 = vmul.f32 %v1093_v39, %v997_v31 }
 0x97b   :  { %v1003_v45 = vadd.f32 %v1094_v43, %v1000_v44 }
 0x97d   :  { %1005 = vst.msk [vmem:[#allocation3] sm:$0xff] %vm40_vm0, %v1003_v45 }
 0x9b2   :  { %v956_v46 = vpop.xlane.xlu1 %955 }
 0x9b3   :  { %v958_v33 = vmul.f32 %v956_v46, %v1454_v18 }
 0x9b4   :  { %v966_v47 = vpop.xlane.xlu0 %965 }
 0x9b5   :  { %v970_v48 = vmul.f32 %v958_v33, %v958_v33  ;;  %v968_v49 = vmul.f32 %v966_v47, %v1454_v18  ;;  %v974_v56 = vsub.f32 %v948_v20, %v958_v33 }
 0x9b7   :  { %v972_v52 = vsub.f32 %v968_v49, %v970_v48 }
 0x9b9   :  { %v976_v50 = vadd.f32 1e-05, %v972_v52 }
 0x9bb   :  { %1135 = vrsqrt.f32 %v976_v50  ;;  %vm993_vm6 = vweird.f32 %v976_v50 }
 0x9c1   :  { %v1136_v41 = vpop.eup %1135 }
 0x9c2   :  { %v988_v51 = vmul.f32 %v1136_v41, %v976_v50  ;;  %vm994_vm5 = vweird.f32 %v1136_v41 }
 0x9c3   :  { %vm995_vm7 = vmor %vm993_vm6, %vm994_vm5 }
 0x9c4   :  { %v989_v30 = vmul.f32 %v1136_v41, %v988_v51 }
 0x9c6   :  { %v990_v53 = vmul.f32 0.5, %v989_v30 }
 0x9c8   :  { %v991_v54 = vsub.f32 1.5, %v990_v53 }
 0x9ca   :  { %v992_v55 = vmul.f32 %v1136_v41, %v991_v54 }
 0x9cc   :  { %v996_v3 = vsel %vm995_vm7, %v1136_v41, %v992_v55 }
 0x9cd   :  { %v998_v4 = vmul.f32 %v996_v3, %v974_v56 }
 0x9cf   :  { %v1001_v18 = vmul.f32 %v1093_v39, %v998_v4 }
 0x9d1   :  { %v1004_v7 = vadd.f32 %v1094_v43, %v1001_v18 }
 0x9d3   :  { %1006 = vst.msk [vmem:[#allocation3 + $0x8] sm:$0xff] %vm40_vm0, %v1004_v7 }
 0x9d4   :  { %1019 = dma.vmem_to_hbm [thread:$0]  %s1012_s4, 256, %s1014_s20, [#allocation4], %s1180_s21, %s1180_s21, %s1175_s9  }
 0x9d5   :  { %1161 = dma.done.wait [#allocation4], 256  }
 0x9d6   :  { %1162 = vsyncadd [#allocation4], 4294967040 }
 0x9d7   :  { %1024 = vsyncpa [#allocation4], 1 }

</bundles_post_ra>
